<compile_context>
chip_gen: v6e
topology: v6e:2x2x1
jax: 0.10.0
libtpu: 0.0.40
codegen_flags: <defaults>
</compile_context>

<pallas_src>
import jax
import jax.numpy as jnp
from jax.experimental import pallas as pl
from jax.experimental.pallas import tpu as pltpu

IN_FEATURES = 1836 + 159          # 1995
HIDDEN = 512
TILE_B_MAX = 1024                 # f32 x stream: 2 x 1024 x 1995 x 4 B ~= 15.6 MiB
VMEM_LIMIT_BYTES = 48 << 20       # above v5e/v6e scoped defaults, below v7x 64 MiB/TC


def _cdiv(a, b):
    return (a + b - 1) // b


def _round_up(n, m):
    return ((n + m - 1) // m) * m


def costnet_kernel(x_ref, w_ref, b_ref, m_ref, o_ref):
    # x_ref: (tile_b, K) f32/bf16    w_ref: (K, HIDDEN) bf16
    # b_ref: (1, HIDDEN) f32         m_ref: (HIDDEN, 1) bf16, filled with 1/HIDDEN
    # o_ref: (tile_b, 1) f32
    x_bf = x_ref[...].astype(jnp.bfloat16)            # in-kernel cast: no extra HBM pass
    h = jnp.dot(x_bf, w_ref[...], preferred_element_type=jnp.float32)
    h = jnp.maximum(h + b_ref[...], 0.0)              # bias + ReLU in f32 on the VPU
    s2 = (h * h).astype(jnp.bfloat16)                 # squares are non-negative
    # Mean over HIDDEN as an MXU matvec against the resident 1/HIDDEN column
    # (frees the XLU from a 512-wide cross-lane reduce; f32 accumulation).
    o_ref[...] = jnp.dot(s2, m_ref[...], preferred_element_type=jnp.float32)


def prepare_params(weight, bias):
    """One-time conversion of PyTorch-layout params to kernel layout.

    weight: (512, 1995), bias: (512,) ->
      w_t:      (1995, 512) bf16   (transposed weight, MXU RHS)
      b2d:      (1, 512)    f32    (bias row)
      mean_vec: (512, 1)    bf16   (1/512 column; 2**-9 is exact in bf16)
    """
    w_t = jnp.asarray(weight, jnp.float32).T.astype(jnp.bfloat16)
    b2d = jnp.asarray(bias, jnp.float32).reshape(1, HIDDEN)
    mean_vec = jnp.full((HIDDEN, 1), 1.0 / HIDDEN, dtype=jnp.bfloat16)
    return w_t, b2d, mean_vec


def _choose_tile_b(B):
    if B < 32:
        return _round_up(B, 8)                        # single small tile
    # Balanced tiles, >= 2 grid steps (keeps both v7x TensorCores busy), capped
    # at TILE_B_MAX, rounded to 16 rows (bf16 sublane packing). Padding is at
    # most one partial tile handled by Pallas edge logic (no jnp.pad of x).
    num_tiles = max(2, _cdiv(B, TILE_B_MAX))
    return min(TILE_B_MAX, _round_up(_cdiv(B, num_tiles), 16))


def costnet_forward(x, w_t, b2d, mean_vec, *, tile_b=None):
    """x: (B, 1995) f32/bf16 -> (B,) f32."""
    B, K = x.shape
    assert K == IN_FEATURES and w_t.shape == (IN_FEATURES, HIDDEN)

    tile_b = _choose_tile_b(B) if tile_b is None else tile_b
    grid = (_cdiv(B, tile_b),)

    cost = pl.CostEstimate(
        flops=2 * grid[0] * tile_b * K * HIDDEN,
        transcendentals=0,
        bytes_accessed=(B * K * x.dtype.itemsize) + (K * HIDDEN * 2)
                       + (HIDDEN * 4) + (HIDDEN * 2) + (B * 4),
    )

    out = pl.pallas_call(
        costnet_kernel,
        out_shape=jax.ShapeDtypeStruct((B, 1), jnp.float32),
        grid=grid,
        in_specs=[
            pl.BlockSpec((tile_b, K), lambda i: (i, 0)),       # streamed x tiles
            pl.BlockSpec((K, HIDDEN), lambda i: (0, 0)),       # resident weight
            pl.BlockSpec((1, HIDDEN), lambda i: (0, 0)),       # resident bias
            pl.BlockSpec((HIDDEN, 1), lambda i: (0, 0)),       # resident 1/HIDDEN column
        ],
        out_specs=pl.BlockSpec((tile_b, 1), lambda i: (i, 0)),
        compiler_params=pltpu.CompilerParams(
            dimension_semantics=("parallel",),    # shards the batch grid on v7x's 2 TCs
            vmem_limit_bytes=VMEM_LIMIT_BYTES,    # large tiles exceed default scoped VMEM
        ),
        cost_estimate=cost,
    )(x, w_t, b2d, mean_vec)
    return out[:, 0]


def costnet_reference(x, weight, bias):
    h = jax.nn.relu(x @ weight.T + bias)
    return jnp.mean(h * h, axis=1)


if __name__ == "__main__":
    key = jax.random.PRNGKey(0)
    kx, kw, kb = jax.random.split(key, 3)

    # Deterministic params (mimics nn.Linear uniform(-1/sqrt(K), 1/sqrt(K))).
    bound = 1.0 / (IN_FEATURES ** 0.5)
    weight = jax.random.uniform(kw, (HIDDEN, IN_FEATURES), jnp.float32, -bound, bound)
    bias = jax.random.uniform(kb, (HIDDEN,), jnp.float32, -bound, bound)
    w_t, b2d, mean_vec = prepare_params(weight, bias)

    fwd = jax.jit(costnet_forward, static_argnames=("tile_b",))

    # Case 1: small batch, single tile.
    B = 8
    x = jax.random.normal(kx, (B, IN_FEATURES), dtype=jnp.float32)
    out = fwd(x, w_t, b2d, mean_vec)
    jax.block_until_ready(out)
    ref = costnet_reference(x, weight, bias)
    assert out.shape == (B,)
    assert jnp.allclose(out, ref, rtol=2e-2, atol=2e-3), (out, ref)

    # Case 2: multi-step grid with an uneven last tile (exercises the pipelined
    # path and the unpadded edge-block handling flagged in the review).
    B2 = 40
    x2 = jax.random.normal(kx, (B2, IN_FEATURES), dtype=jnp.float32)
    out2 = fwd(x2, w_t, b2d, mean_vec, tile_b=16)     # grid=(3,), last tile 8/16 rows valid
    jax.block_until_ready(out2)
    ref2 = costnet_reference(x2, weight, bias)
    assert out2.shape == (B2,)
    assert jnp.allclose(out2, ref2, rtol=2e-2, atol=2e-3), (out2, ref2)

    print("KERNEL_OK")
</pallas_src>

<mosaic_0001>
module attributes {stable_mosaic.version = 11 : i64} {
  func.func @costnet_kernel(%arg0: i32, %arg1: memref<8x1995xf32, #tpu.memory_space<vmem>>, %arg2: memref<1995x512xbf16, #tpu.memory_space<vmem>>, %arg3: memref<1x512xf32, #tpu.memory_space<vmem>>, %arg4: memref<512x1xbf16, #tpu.memory_space<vmem>>, %arg5: memref<8x1xf32, #tpu.memory_space<vmem>>) attributes {dimension_semantics = [#tpu.dimension_semantics<parallel>], iteration_bounds = array<i64: 1>, scalar_prefetch = 0 : i64, scratch_operands = 0 : i64, tpu.core_type = #tpu.core_type<tc>, window_params = [{transform_indices = @transform_0, window_bounds = array<i64: 8, 1995>}, {pipeline_mode = #tpu.pipeline_mode<synchronous>, transform_indices = @transform_1, window_bounds = array<i64: 1995, 512>}, {pipeline_mode = #tpu.pipeline_mode<synchronous>, transform_indices = @transform_2, window_bounds = array<i64: 1, 512>}, {pipeline_mode = #tpu.pipeline_mode<synchronous>, transform_indices = @transform_3, window_bounds = array<i64: 512, 1>}, {transform_indices = @transform_4, window_bounds = array<i64: 8, 1>}]} {
    %c0 = arith.constant 0 : index
    %c0_0 = arith.constant 0 : index
    %0 = vector.load %arg1[%c0, %c0_0] : memref<8x1995xf32, #tpu.memory_space<vmem>>, vector<8x1995xf32>
    %1 = arith.truncf %0 : vector<8x1995xf32> to vector<8x1995xbf16>
    %c0_1 = arith.constant 0 : index
    %c0_2 = arith.constant 0 : index
    %2 = vector.load %arg2[%c0_1, %c0_2] : memref<1995x512xbf16, #tpu.memory_space<vmem>>, vector<1995x512xbf16>
    %cst = arith.constant dense<0.000000e+00> : vector<8x512xf32>
    %3 = tpu.matmul %1, %2, %cst {dimension_numbers = #tpu.dot_dimension_numbers<[1], [0], [0], [1], [0, 0, 1, 1], [], []>} : vector<8x1995xbf16>, vector<1995x512xbf16>, vector<8x512xf32> -> vector<8x512xf32>
    %c0_3 = arith.constant 0 : index
    %c0_4 = arith.constant 0 : index
    %4 = vector.load %arg3[%c0_3, %c0_4] : memref<1x512xf32, #tpu.memory_space<vmem>>, vector<1x512xf32>
    %5 = vector.broadcast %4 : vector<1x512xf32> to vector<8x512xf32>
    %6 = arith.addf %3, %5 : vector<8x512xf32>
    %cst_5 = arith.constant 0.000000e+00 : f32
    %7 = vector.broadcast %cst_5 : f32 to vector<8x512xf32>
    %8 = arith.maximumf %6, %7 : vector<8x512xf32>
    %9 = arith.mulf %8, %8 : vector<8x512xf32>
    %10 = arith.truncf %9 : vector<8x512xf32> to vector<8x512xbf16>
    %c0_6 = arith.constant 0 : index
    %c0_7 = arith.constant 0 : index
    %11 = vector.load %arg4[%c0_6, %c0_7] : memref<512x1xbf16, #tpu.memory_space<vmem>>, vector<512x1xbf16>
    %cst_8 = arith.constant dense<0.000000e+00> : vector<8x1xf32>
    %12 = tpu.matmul %10, %11, %cst_8 {dimension_numbers = #tpu.dot_dimension_numbers<[1], [0], [0], [1], [0, 0, 1, 1], [], []>} : vector<8x512xbf16>, vector<512x1xbf16>, vector<8x1xf32> -> vector<8x1xf32>
    %c0_9 = arith.constant 0 : index
    %c0_10 = arith.constant 0 : index
    %13 = vector.load %arg5[%c0_9, %c0_10] : memref<8x1xf32, #tpu.memory_space<vmem>>, vector<8x1xf32>
    tpu.vector_store %arg5[%c0_9, %c0_10], %12 {strides = array<i32>} : memref<8x1xf32, #tpu.memory_space<vmem>>, vector<8x1xf32>,
    return
  }
  func.func @transform_0(%arg0: i32) -> (i32, i32) {
    %c0_i32 = arith.constant 0 : i32
    %c0_i32_0 = arith.constant 0 : i32
    return %arg0, %c0_i32 : i32, i32
  }
  func.func @transform_1(%arg0: i32) -> (i32, i32) {
    %c0_i32 = arith.constant 0 : i32
    %c0_i32_0 = arith.constant 0 : i32
    %c0_i32_1 = arith.constant 0 : i32
    return %c0_i32, %c0_i32_0 : i32, i32
  }
  func.func @transform_2(%arg0: i32) -> (i32, i32) {
    %c0_i32 = arith.constant 0 : i32
    %c0_i32_0 = arith.constant 0 : i32
    %c0_i32_1 = arith.constant 0 : i32
    return %c0_i32, %c0_i32_0 : i32, i32
  }
  func.func @transform_3(%arg0: i32) -> (i32, i32) {
    %c0_i32 = arith.constant 0 : i32
    %c0_i32_0 = arith.constant 0 : i32
    %c0_i32_1 = arith.constant 0 : i32
    return %c0_i32, %c0_i32_0 : i32, i32
  }
  func.func @transform_4(%arg0: i32) -> (i32, i32) {
    %c0_i32 = arith.constant 0 : i32
    %c0_i32_0 = arith.constant 0 : i32
    return %arg0, %c0_i32 : i32, i32
  }
}

</mosaic_0001>

<bundles_post_ra>
// kernel: costnet_forward.1
= control target key start
LH: loop header
LB: loop body
LE: loop exit
PB: predicated region body
PF: predicated region fallthrough
CT: control target
= control target key end

     0   :  { %9 = vsyncpa [#allocation3], 0  ;;  %s5812_s0 = inlined_call_operand.hbm [shape: f32[8,1995], index: 0, kind: input, shape index: {}]   ;;  %s5813_s1 = inlined_call_operand.hbm [shape: bf16[1995,512], index: 1, kind: input, shape index: {}]   ;;  %s5814_s2 = inlined_call_operand.hbm [shape: f32[1,512], index: 2, kind: input, shape index: {}]   ;;  %s5815_s3 = inlined_call_operand.vmem [shape: bf16[512,1], index: 3, kind: input, shape index: {}]   ;;  %s5816_s4 = inlined_call_operand.vmem [shape: f32[8,1], index: 4, kind: output, shape index: {}]  }
   0x1   :  { %10 = vsyncpa [#allocation5], 0  ;;  %s5568_s15 = smov [#allocation4]  }
   0x2   :  { %s26_s16 = sshll.u32 %s5568_s15, 4  ;;  %s27_s16 = int_to_ptr.vmem [resolvable:$true] %s26_s16 }
   0x3   :  { %s5512_s17 = scalar_lea.vmem %s27_s16, 64000  ;;  %p5517_p1 = scmp.lt.s32.totalorder %s27_s16, %s27_s16 }
   0x4   :  { %p5513_p0 = scmp.ne.s32.totalorder %s27_s16, %s5512_s17  ;;  %p5518_p2 = scmp.lt.s32.totalorder %s5512_s17, %s5512_s17 }
   0x6   :  { %p5519_p3 = por %p5518_p2, %p5517_p1 }
   0x8   :  { %p5520_p4 = pnand %p5519_p3, %p5513_p0 }
   0xa   :  { %5523 = shalt.err (!%p5520_p4)
}
   0xb   :  { %s5569_s18 = smov 256   ;;  %s5570_s19 = smov 16  }
   0xc   :  { %32 = dma.hbm_to_vmem [thread:$0]  %s5813_s1, 64000, %s27_s16, [#allocation5], %s5569_s18, %s5569_s18, %s5570_s19  }
   0xd   :  { %s5571_s22 = smov [#allocation2]   ;;  %s5572_s24 = smov [#allocation6]  }
   0xe   :  { %s17_s23 = sshll.u32 %s5571_s22, 4  ;;  %s39_s25 = sshll.u32 %s5572_s24, 4  ;;  %s18_s23 = int_to_ptr.vmem [resolvable:$true] %s17_s23  ;;  %s40_s25 = int_to_ptr.vmem [resolvable:$true] %s39_s25 }
   0xf   :  { %s5532_s26 = scalar_lea.vmem %s18_s23, 2048  ;;  %p5537_p6 = scmp.lt.s32.totalorder %s18_s23, %s18_s23 }
  0x10   :  { %p5533_p5 = scmp.ne.s32.totalorder %s18_s23, %s5532_s26  ;;  %p5538_p7 = scmp.lt.s32.totalorder %s5532_s26, %s5532_s26 }
  0x12   :  { %p5539_p8 = por %p5538_p7, %p5537_p6 }
  0x14   :  { %p5540_p9 = pnand %p5539_p8, %p5533_p5 }
  0x16   :  { %5543 = shalt.err (!%p5540_p9)
}
  0x17   :  { %20 = dma.hbm_to_vmem [thread:$0]  %s5812_s0, 2048, %s18_s23, [#allocation3]  }
  0x18   :  { %s5552_s29 = scalar_lea.vmem %s40_s25, 64  ;;  %p5557_p11 = scmp.lt.s32.totalorder %s40_s25, %s40_s25 }
  0x19   :  { %p5553_p10 = scmp.ne.s32.totalorder %s40_s25, %s5552_s29  ;;  %p5558_p12 = scmp.lt.s32.totalorder %s5552_s29, %s5552_s29 }
  0x1b   :  { %p5559_p13 = por %p5558_p12, %p5557_p11 }
  0x1d   :  { %p5560_p0 = pnand %p5559_p13, %p5553_p10 }
  0x1f   :  { %5563 = shalt.err (!%p5560_p0)
}
  0x20   :  { %42 = dma.hbm_to_vmem [thread:$0]  %s5814_s2, 64, %s40_s25, [#allocation5]  }
  0x21   :  { %5564 = dma.done.wait [#allocation3], 2048  }
  0x22   :  { %5565 = vsyncadd [#allocation3], 4294965248 }
  0x23   :  { %5566 = dma.done.wait [#allocation5], 64064  }
  0x24   :  { %5567 = vsyncadd [#allocation5], 4294903232  ;;  %v4721_v0 = vld [vmem:[#allocation4 + $0xe4] ss:$16 sps:$4 sm:$0xff]   ;;  %v4725_v2 = vld [vmem:[#allocation4 + $0xe0] ss:$16 sps:$4 sm:$0xff]  }
  0x25   :  { %v4723_v1 = vld [vmem:[#allocation4 + $0x2e4] ss:$16 sps:$4 sm:$0xff]   ;;  %3125 = vmatprep.subr.bf16.mxu0 %v4721_v0  ;;  %v4726_v3 = vld [vmem:[#allocation4 + $0x2e0] ss:$16 sps:$4 sm:$0xff]   ;;  %v56_v46 = vld [vmem:[#allocation2 + $0x8] sm:$0xff]  ;;  %vm3105_vm0 = vcmask 613376  }
  0x26   :  { %3166 = vmatprep.subr.bf16.mxu1 %v4723_v1  ;;  %v4727_v4 = vld [vmem:[#allocation4 + $0xc4] ss:$16 sps:$4 sm:$0xff]   ;;  %3126 = vmatpush1.bf16.msra.mxu0 %v4725_v2  ;;  %v4731_v6 = vld [vmem:[#allocation4 + $0xc0] ss:$16 sps:$4 sm:$0xff]   ;;  %v5608_v49 = vpack.c.bf16 %v56_v46, %v56_v46  ;;  %v58_v50 = vld [vmem:[#allocation2 + $0x18] sm:$0xff]  ;;  %vm3109_vm1 = vcmask 1044480  }
  0x27   :  { %3167 = vmatpush1.bf16.msra.mxu1 %v4726_v3  ;;  %v4729_v5 = vld [vmem:[#allocation4 + $0x2c4] ss:$16 sps:$4 sm:$0xff]   ;;  %3127 = vmatprep.subr.bf16.mxu0 %v4727_v4  ;;  %v4732_v7 = vld [vmem:[#allocation4 + $0x2c0] ss:$16 sps:$4 sm:$0xff]   ;;  %v5610_v52 = vpack.c.bf16 %v58_v50, %v58_v50  ;;  %vm3110_vm2 = vcmask 1045504   ;;  %vm4129_vm3 = vcmask 7168  }
  0x28   :  { %3168 = vmatprep.subr.bf16.mxu1 %v4729_v5  ;;  %v4733_v8 = vld [vmem:[#allocation4 + $0xa4] ss:$16 sps:$4 sm:$0xff]   ;;  %v4737_v10 = vld [vmem:[#allocation4 + $0xa0] ss:$16 sps:$4 sm:$0xff]   ;;  %3157 = vmatprep.mubr.bf16.mxu0 %v5608_v49 }
  0x29   :  { %v4735_v9 = vld [vmem:[#allocation4 + $0x2a4] ss:$16 sps:$4 sm:$0xff]   ;;  %v4738_v11 = vld [vmem:[#allocation4 + $0x2a0] ss:$16 sps:$4 sm:$0xff]   ;;  %3198 = vmatprep.mubr.bf16.mxu1 %v5610_v52 }
  0x2a   :  { %3128 = vmatpush1.bf16.msra.mxu0 %v4731_v6  ;;  %v4739_v12 = vld [vmem:[#allocation4 + $0x84] ss:$16 sps:$4 sm:$0xff]   ;;  %v4743_v14 = vld [vmem:[#allocation4 + $0x80] ss:$16 sps:$4 sm:$0xff]  }
  0x2b   :  { %3169 = vmatpush1.bf16.msra.mxu1 %v4732_v7  ;;  %3129 = vmatprep.subr.bf16.mxu0 %v4733_v8  ;;  %v4741_v13 = vld [vmem:[#allocation4 + $0x284] ss:$16 sps:$4 sm:$0xff]   ;;  %v4744_v15 = vld [vmem:[#allocation4 + $0x280] ss:$16 sps:$4 sm:$0xff]  }
  0x2c   :  { %3170 = vmatprep.subr.bf16.mxu1 %v4735_v9  ;;  %v4745_v16 = vld [vmem:[#allocation4 + $0x64] ss:$16 sps:$4 sm:$0xff]   ;;  %v4749_v18 = vld [vmem:[#allocation4 + $0x60] ss:$16 sps:$4 sm:$0xff]  }
  0x2d   :  { %v4747_v17 = vld [vmem:[#allocation4 + $0x264] ss:$16 sps:$4 sm:$0xff]   ;;  %v4750_v19 = vld [vmem:[#allocation4 + $0x260] ss:$16 sps:$4 sm:$0xff]  }
  0x2e   :  { %3130 = vmatpush1.bf16.msra.mxu0 %v4737_v10  ;;  %v4751_v20 = vld [vmem:[#allocation4 + $0x44] ss:$16 sps:$4 sm:$0xff]   ;;  %v4755_v22 = vld [vmem:[#allocation4 + $0x40] ss:$16 sps:$4 sm:$0xff]  }
  0x2f   :  { %3171 = vmatpush1.bf16.msra.mxu1 %v4738_v11  ;;  %3131 = vmatprep.subr.bf16.mxu0 %v4739_v12  ;;  %v4753_v21 = vld [vmem:[#allocation4 + $0x244] ss:$16 sps:$4 sm:$0xff]   ;;  %v4756_v23 = vld [vmem:[#allocation4 + $0x240] ss:$16 sps:$4 sm:$0xff]  }
  0x30   :  { %3172 = vmatprep.subr.bf16.mxu1 %v4741_v13  ;;  %v4757_v24 = vld [vmem:[#allocation4 + $0x24] ss:$16 sps:$4 sm:$0xff]   ;;  %v4761_v26 = vld [vmem:[#allocation4 + $0x20] ss:$16 sps:$4 sm:$0xff]  }
  0x31   :  { %v4759_v25 = vld [vmem:[#allocation4 + $0x224] ss:$16 sps:$4 sm:$0xff]   ;;  %v4762_v27 = vld [vmem:[#allocation4 + $0x220] ss:$16 sps:$4 sm:$0xff]  }
  0x32   :  { %3132 = vmatpush1.bf16.msra.mxu0 %v4743_v14  ;;  %v4763_v28 = vld [vmem:[#allocation4 + $0x4] ss:$16 sps:$4 sm:$0xff]   ;;  %v4767_v30 = vld [vmem:[#allocation4] ss:$16 sps:$4 sm:$0xff]  }
  0x33   :  { %3173 = vmatpush1.bf16.msra.mxu1 %v4744_v15  ;;  %3133 = vmatprep.subr.bf16.mxu0 %v4745_v16  ;;  %v4765_v29 = vld [vmem:[#allocation4 + $0x204] ss:$16 sps:$4 sm:$0xff]   ;;  %v4768_v31 = vld [vmem:[#allocation4 + $0x200] ss:$16 sps:$4 sm:$0xff]  }
  0x34   :  { %3174 = vmatprep.subr.bf16.mxu1 %v4747_v17  ;;  %v4769_v32 = vld [vmem:[#allocation4 + $0x1e4] ss:$16 sps:$4 sm:$0xff]   ;;  %v4773_v34 = vld [vmem:[#allocation4 + $0x1e0] ss:$16 sps:$4 sm:$0xff]  }
  0x35   :  { %v4771_v33 = vld [vmem:[#allocation4 + $0x3e4] ss:$16 sps:$4 sm:$0xff]   ;;  %v4774_v35 = vld [vmem:[#allocation4 + $0x3e0] ss:$16 sps:$4 sm:$0xff]  }
  0x36   :  { %3134 = vmatpush1.bf16.msra.mxu0 %v4749_v18  ;;  %v4775_v36 = vld [vmem:[#allocation4 + $0x1c4] ss:$16 sps:$4 sm:$0xff]   ;;  %v4779_v38 = vld [vmem:[#allocation4 + $0x1c0] ss:$16 sps:$4 sm:$0xff]  }
  0x37   :  { %3175 = vmatpush1.bf16.msra.mxu1 %v4750_v19  ;;  %3135 = vmatprep.subr.bf16.mxu0 %v4751_v20  ;;  %v4777_v37 = vld [vmem:[#allocation4 + $0x3c4] ss:$16 sps:$4 sm:$0xff]   ;;  %v4780_v39 = vld [vmem:[#allocation4 + $0x3c0] ss:$16 sps:$4 sm:$0xff]  }
  0x38   :  { %3176 = vmatprep.subr.bf16.mxu1 %v4753_v21  ;;  %v4781_v40 = vld [vmem:[#allocation4 + $0x1a4] ss:$16 sps:$4 sm:$0xff]   ;;  %v4785_v42 = vld [vmem:[#allocation4 + $0x1a0] ss:$16 sps:$4 sm:$0xff]  }
  0x39   :  { %v4783_v41 = vld [vmem:[#allocation4 + $0x3a4] ss:$16 sps:$4 sm:$0xff]   ;;  %v4786_v43 = vld [vmem:[#allocation4 + $0x3a0] ss:$16 sps:$4 sm:$0xff]  }
  0x3a   :  { %3136 = vmatpush1.bf16.msra.mxu0 %v4755_v22  ;;  %v4787_v44 = vld [vmem:[#allocation4 + $0x184] ss:$16 sps:$4 sm:$0xff]   ;;  %v4791_v47 = vld [vmem:[#allocation4 + $0x180] ss:$16 sps:$4 sm:$0xff]  }
  0x3b   :  { %3177 = vmatpush1.bf16.msra.mxu1 %v4756_v23  ;;  %3137 = vmatprep.subr.bf16.mxu0 %v4757_v24  ;;  %v4789_v45 = vld [vmem:[#allocation4 + $0x384] ss:$16 sps:$4 sm:$0xff]   ;;  %v4792_v48 = vld [vmem:[#allocation4 + $0x380] ss:$16 sps:$4 sm:$0xff]  }
  0x3c   :  { %3178 = vmatprep.subr.bf16.mxu1 %v4759_v25  ;;  %v4793_v51 = vld [vmem:[#allocation4 + $0x164] ss:$16 sps:$4 sm:$0xff]   ;;  %v4797_v54 = vld [vmem:[#allocation4 + $0x160] ss:$16 sps:$4 sm:$0xff]  }
  0x3d   :  { %v4795_v53 = vld [vmem:[#allocation4 + $0x364] ss:$16 sps:$4 sm:$0xff]   ;;  %v4798_v55 = vld [vmem:[#allocation4 + $0x360] ss:$16 sps:$4 sm:$0xff]  }
  0x3e   :  { %3138 = vmatpush1.bf16.msra.mxu0 %v4761_v26  ;;  %v4799_v56 = vld [vmem:[#allocation4 + $0x144] ss:$16 sps:$4 sm:$0xff]   ;;  %v4803_v58 = vld [vmem:[#allocation4 + $0x140] ss:$16 sps:$4 sm:$0xff]  }
  0x3f   :  { %3179 = vmatpush1.bf16.msra.mxu1 %v4762_v27  ;;  %3139 = vmatprep.subr.bf16.mxu0 %v4763_v28  ;;  %v4801_v57 = vld [vmem:[#allocation4 + $0x344] ss:$16 sps:$4 sm:$0xff]   ;;  %v4804_v59 = vld [vmem:[#allocation4 + $0x340] ss:$16 sps:$4 sm:$0xff]  }
  0x40   :  { %3180 = vmatprep.subr.bf16.mxu1 %v4765_v29  ;;  %v4805_v60 = vld [vmem:[#allocation4 + $0x124] ss:$16 sps:$4 sm:$0xff]   ;;  %v4809_v62 = vld [vmem:[#allocation4 + $0x120] ss:$16 sps:$4 sm:$0xff]  }
  0x41   :  { %v4807_v61 = vld [vmem:[#allocation4 + $0x324] ss:$16 sps:$4 sm:$0xff]   ;;  %v4810_v63 = vld [vmem:[#allocation4 + $0x320] ss:$16 sps:$4 sm:$0xff]  }
  0x42   :  { %3140 = vmatpush1.bf16.msra.mxu0 %v4767_v30  ;;  %v4811_v0 = vld [vmem:[#allocation4 + $0x104] ss:$16 sps:$4 sm:$0xff]   ;;  %v4815_v2 = vld [vmem:[#allocation4 + $0x100] ss:$16 sps:$4 sm:$0xff]  }
  0x43   :  { %3181 = vmatpush1.bf16.msra.mxu1 %v4768_v31  ;;  %3141 = vmatprep.subr.bf16.mxu0 %v4769_v32  ;;  %v4813_v1 = vld [vmem:[#allocation4 + $0x304] ss:$16 sps:$4 sm:$0xff]   ;;  %v4816_v3 = vld [vmem:[#allocation4 + $0x300] ss:$16 sps:$4 sm:$0xff]  }
  0x44   :  { %3182 = vmatprep.subr.bf16.mxu1 %v4771_v33  ;;  %v55_v4 = vld [vmem:[#allocation2] sm:$0xff]  ;;  %v57_v5 = vld [vmem:[#allocation2 + $0x10] sm:$0xff] }
  0x45   :  { %v4819_v6 = vld [vmem:[#allocation4 + $0x4e4] ss:$16 sps:$4 sm:$0xff]   ;;  %v5614_v8 = vpack.c.bf16 %v55_v4, %v55_v4  ;;  %v5616_v9 = vpack.c.bf16 %v57_v5, %v57_v5  ;;  %v4817_v10 = vld [vmem:[#allocation4 + $0x4e0] ss:$16 sps:$4 sm:$0xff]  }
  0x46   :  { %3142 = vmatpush2.bf16.msra.mxu0 %v4773_v34  ;;  %v4822_v7 = vld [vmem:[#allocation4 + $0x6e4] ss:$16 sps:$4 sm:$0xff]   ;;  %v4820_v11 = vld [vmem:[#allocation4 + $0x6e0] ss:$16 sps:$4 sm:$0xff]   ;;  %v60_v34 = vld [vmem:[#allocation2 + $0x28] sm:$0xff] }
  0x47   :  { %3183 = vmatpush2.bf16.msra.mxu1 %v4774_v35  ;;  %3143 = vmatprep.subr.bf16.mxu0 %v4775_v36  ;;  %v4825_v12 = vld [vmem:[#allocation4 + $0x4c4] ss:$16 sps:$4 sm:$0xff]   ;;  %v4823_v14 = vld [vmem:[#allocation4 + $0x4c0] ss:$16 sps:$4 sm:$0xff]  }
  0x48   :  { %3184 = vmatprep.subr.bf16.mxu1 %v4777_v37  ;;  %v4828_v13 = vld [vmem:[#allocation4 + $0x6c4] ss:$16 sps:$4 sm:$0xff]   ;;  %v4826_v15 = vld [vmem:[#allocation4 + $0x6c0] ss:$16 sps:$4 sm:$0xff]   ;;  %v5620_v37 = vpack.c.bf16 %v60_v34, %v60_v34 }
  0x49   :  { %v4831_v16 = vld [vmem:[#allocation4 + $0x4a4] ss:$16 sps:$4 sm:$0xff]   ;;  %v4829_v18 = vld [vmem:[#allocation4 + $0x4a0] ss:$16 sps:$4 sm:$0xff]  }
  0x4a   :  { %3144 = vmatpush2.bf16.msra.mxu0 %v4779_v38  ;;  %v4834_v17 = vld [vmem:[#allocation4 + $0x6a4] ss:$16 sps:$4 sm:$0xff]   ;;  %v4832_v19 = vld [vmem:[#allocation4 + $0x6a0] ss:$16 sps:$4 sm:$0xff]   ;;  %v62_v38 = vld [vmem:[#allocation2 + $0x38] sm:$0xff] }
  0x4b   :  { %3185 = vmatpush2.bf16.msra.mxu1 %v4780_v39  ;;  %3145 = vmatprep.subr.bf16.mxu0 %v4781_v40  ;;  %v4837_v20 = vld [vmem:[#allocation4 + $0x484] ss:$16 sps:$4 sm:$0xff]   ;;  %v4835_v22 = vld [vmem:[#allocation4 + $0x480] ss:$16 sps:$4 sm:$0xff]   ;;  %v5622_v40 = vpack.c.bf16 %v62_v38, %v62_v38 }
  0x4c   :  { %3186 = vmatprep.subr.bf16.mxu1 %v4783_v41  ;;  %v4840_v21 = vld [vmem:[#allocation4 + $0x684] ss:$16 sps:$4 sm:$0xff]   ;;  %v4838_v23 = vld [vmem:[#allocation4 + $0x680] ss:$16 sps:$4 sm:$0xff]  }
  0x4d   :  { %v4843_v24 = vld [vmem:[#allocation4 + $0x464] ss:$16 sps:$4 sm:$0xff]   ;;  %v4841_v26 = vld [vmem:[#allocation4 + $0x460] ss:$16 sps:$4 sm:$0xff]  }
  0x4e   :  { %3146 = vmatpush2.bf16.msra.mxu0 %v4785_v42  ;;  %v4846_v25 = vld [vmem:[#allocation4 + $0x664] ss:$16 sps:$4 sm:$0xff]   ;;  %v4844_v27 = vld [vmem:[#allocation4 + $0x660] ss:$16 sps:$4 sm:$0xff]  }
  0x4f   :  { %3187 = vmatpush2.bf16.msra.mxu1 %v4786_v43  ;;  %3147 = vmatprep.subr.bf16.mxu0 %v4787_v44  ;;  %v4849_v28 = vld [vmem:[#allocation4 + $0x444] ss:$16 sps:$4 sm:$0xff]   ;;  %v4847_v30 = vld [vmem:[#allocation4 + $0x440] ss:$16 sps:$4 sm:$0xff]  }
  0x50   :  { %3188 = vmatprep.subr.bf16.mxu1 %v4789_v45  ;;  %v4852_v29 = vld [vmem:[#allocation4 + $0x644] ss:$16 sps:$4 sm:$0xff]   ;;  %v4850_v31 = vld [vmem:[#allocation4 + $0x640] ss:$16 sps:$4 sm:$0xff]  }
  0x51   :  { %v4855_v32 = vld [vmem:[#allocation4 + $0x424] ss:$16 sps:$4 sm:$0xff]   ;;  %v4853_v35 = vld [vmem:[#allocation4 + $0x420] ss:$16 sps:$4 sm:$0xff]  }
  0x52   :  { %3148 = vmatpush2.bf16.msra.mxu0 %v4791_v47  ;;  %v4858_v33 = vld [vmem:[#allocation4 + $0x624] ss:$16 sps:$4 sm:$0xff]   ;;  %v4856_v36 = vld [vmem:[#allocation4 + $0x620] ss:$16 sps:$4 sm:$0xff]  }
  0x53   :  { %3189 = vmatpush2.bf16.msra.mxu1 %v4792_v48  ;;  %3149 = vmatprep.subr.bf16.mxu0 %v4793_v51  ;;  %v4861_v39 = vld [vmem:[#allocation4 + $0x404] ss:$16 sps:$4 sm:$0xff]   ;;  %v4859_v42 = vld [vmem:[#allocation4 + $0x400] ss:$16 sps:$4 sm:$0xff]  }
  0x54   :  { %3190 = vmatprep.subr.bf16.mxu1 %v4795_v53  ;;  %v4864_v41 = vld [vmem:[#allocation4 + $0x604] ss:$16 sps:$4 sm:$0xff]   ;;  %v4862_v43 = vld [vmem:[#allocation4 + $0x600] ss:$16 sps:$4 sm:$0xff]  }
  0x55   :  { %v4867_v44 = vld [vmem:[#allocation4 + $0x5e4] ss:$16 sps:$4 sm:$0xff]   ;;  %v4865_v46 = vld [vmem:[#allocation4 + $0x5e0] ss:$16 sps:$4 sm:$0xff]  }
  0x56   :  { %3150 = vmatpush2.bf16.msra.mxu0 %v4797_v54  ;;  %v4870_v45 = vld [vmem:[#allocation4 + $0x7e4] ss:$16 sps:$4 sm:$0xff]   ;;  %v4868_v47 = vld [vmem:[#allocation4 + $0x7e0] ss:$16 sps:$4 sm:$0xff]  }
  0x57   :  { %3191 = vmatpush2.bf16.msra.mxu1 %v4798_v55  ;;  %3151 = vmatprep.subr.bf16.mxu0 %v4799_v56  ;;  %v4873_v48 = vld [vmem:[#allocation4 + $0x5c4] ss:$16 sps:$4 sm:$0xff]   ;;  %v4871_v51 = vld [vmem:[#allocation4 + $0x5c0] ss:$16 sps:$4 sm:$0xff]  }
  0x58   :  { %3192 = vmatprep.subr.bf16.mxu1 %v4801_v57  ;;  %v4876_v50 = vld [vmem:[#allocation4 + $0x7c4] ss:$16 sps:$4 sm:$0xff]   ;;  %v4874_v53 = vld [vmem:[#allocation4 + $0x7c0] ss:$16 sps:$4 sm:$0xff]  }
  0x59   :  { %v4879_v54 = vld [vmem:[#allocation4 + $0x5a4] ss:$16 sps:$4 sm:$0xff]   ;;  %v4877_v56 = vld [vmem:[#allocation4 + $0x5a0] ss:$16 sps:$4 sm:$0xff]  }
  0x5a   :  { %3152 = vmatpush2.bf16.msra.mxu0 %v4803_v58  ;;  %v4882_v55 = vld [vmem:[#allocation4 + $0x7a4] ss:$16 sps:$4 sm:$0xff]   ;;  %v4880_v57 = vld [vmem:[#allocation4 + $0x7a0] ss:$16 sps:$4 sm:$0xff]  }
  0x5b   :  { %3193 = vmatpush2.bf16.msra.mxu1 %v4804_v59  ;;  %3153 = vmatprep.subr.bf16.mxu0 %v4805_v60  ;;  %v4885_v58 = vld [vmem:[#allocation4 + $0x584] ss:$16 sps:$4 sm:$0xff]   ;;  %v4883_v60 = vld [vmem:[#allocation4 + $0x580] ss:$16 sps:$4 sm:$0xff]  }
  0x5c   :  { %3194 = vmatprep.subr.bf16.mxu1 %v4807_v61  ;;  %v4888_v59 = vld [vmem:[#allocation4 + $0x784] ss:$16 sps:$4 sm:$0xff]   ;;  %v4886_v61 = vld [vmem:[#allocation4 + $0x780] ss:$16 sps:$4 sm:$0xff]  }
  0x5d   :  { %v4895_v4 = vld [vmem:[#allocation4 + $0x540] ss:$16 sps:$4 sm:$0xff]   ;;  %v4936_v38 = vld [vmem:[#allocation4 + $0xa84] ss:$16 sps:$4 sm:$0xff]  }
  0x5e   :  { %3154 = vmatpush2.bf16.msra.mxu0 %v4809_v62  ;;  %v4891_v62 = vld [vmem:[#allocation4 + $0x564] ss:$16 sps:$4 sm:$0xff]   ;;  %v4898_v5 = vld [vmem:[#allocation4 + $0x740] ss:$16 sps:$4 sm:$0xff]  }
  0x5f   :  { %3195 = vmatpush2.bf16.msra.mxu1 %v4810_v63  ;;  %3155 = vmatprep.subr.bf16.mxu0 %v4811_v0  ;;  %v4894_v63 = vld [vmem:[#allocation4 + $0x764] ss:$16 sps:$4 sm:$0xff]   ;;  %v4889_v0 = vld [vmem:[#allocation4 + $0x560] ss:$16 sps:$4 sm:$0xff]  }
  0x60   :  { %3196 = vmatprep.subr.bf16.mxu1 %v4813_v1  ;;  %v4892_v1 = vld [vmem:[#allocation4 + $0x760] ss:$16 sps:$4 sm:$0xff]  }
  0x61   :  { %v4925_v34 = vld [vmem:[#allocation4 + $0x8a0] ss:$16 sps:$4 sm:$0xff]  }
  0x62   :  { %3156 = vmatpush2.bf16.msra.mxu0 %v4815_v2  ;;  %v4897_v2 = vld [vmem:[#allocation4 + $0x544] ss:$16 sps:$4 sm:$0xff]  }
  0x63   :  { %3197 = vmatpush2.bf16.msra.mxu1 %v4816_v3  ;;  %3207 = vmatprep.subr.bf16.mxu0 %v4819_v6  ;;  %v4900_v3 = vld [vmem:[#allocation4 + $0x744] ss:$16 sps:$4 sm:$0xff]  }
  0x64   :  { %3248 = vmatprep.subr.bf16.mxu1 %v4822_v7  ;;  %v4903_v6 = vld [vmem:[#allocation4 + $0x524] ss:$16 sps:$4 sm:$0xff]  }
  0x65   :  { %3158 = vmatmul.mubr.bf16.vlgmr.msra.gmra.mxu0 %v5614_v8  ;;  %v4906_v7 = vld [vmem:[#allocation4 + $0x724] ss:$16 sps:$4 sm:$0xff]  }
  0x66   :  { %3199 = vmatmul.mubr.bf16.vlgmr.msra.gmra.mxu1 %v5616_v9  ;;  %3208 = vmatpush1.bf16.msra.mxu0 %v4817_v10  ;;  %v4901_v10 = vld [vmem:[#allocation4 + $0x520] ss:$16 sps:$4 sm:$0xff]  }
  0x67   :  { %3249 = vmatpush1.bf16.msra.mxu1 %v4820_v11  ;;  %3209 = vmatprep.subr.bf16.mxu0 %v4825_v12  ;;  %v4904_v11 = vld [vmem:[#allocation4 + $0x720] ss:$16 sps:$4 sm:$0xff]   ;;  %v4909_v12 = vld [vmem:[#allocation4 + $0x504] ss:$16 sps:$4 sm:$0xff]  }
  0x68   :  { %3250 = vmatprep.subr.bf16.mxu1 %v4828_v13  ;;  %3239 = vmatprep.mubr.bf16.mxu0 %v5620_v37  ;;  %v4912_v13 = vld [vmem:[#allocation4 + $0x704] ss:$16 sps:$4 sm:$0xff]  }
  0x69   :  { %3280 = vmatprep.mubr.bf16.mxu1 %v5622_v40 }
  0x6a   :  { %3210 = vmatpush1.bf16.msra.mxu0 %v4823_v14  ;;  %v4907_v14 = vld [vmem:[#allocation4 + $0x500] ss:$16 sps:$4 sm:$0xff]  }
  0x6b   :  { %3251 = vmatpush1.bf16.msra.mxu1 %v4826_v15  ;;  %3211 = vmatprep.subr.bf16.mxu0 %v4831_v16  ;;  %v4910_v15 = vld [vmem:[#allocation4 + $0x700] ss:$16 sps:$4 sm:$0xff]  }
  0x6c   :  { %3252 = vmatprep.subr.bf16.mxu1 %v4834_v17  ;;  %v59_v16 = vld [vmem:[#allocation2 + $0x20] sm:$0xff]  ;;  %v61_v17 = vld [vmem:[#allocation2 + $0x30] sm:$0xff] }
  0x6e   :  { %3212 = vmatpush1.bf16.msra.mxu0 %v4829_v18  ;;  %v4915_v18 = vld [vmem:[#allocation4 + $0x8e4] ss:$16 sps:$4 sm:$0xff]  }
  0x6f   :  { %3253 = vmatpush1.bf16.msra.mxu1 %v4832_v19  ;;  %3213 = vmatprep.subr.bf16.mxu0 %v4837_v20  ;;  %v4918_v19 = vld [vmem:[#allocation4 + $0xae4] ss:$16 sps:$4 sm:$0xff]   ;;  %v5626_v20 = vpack.c.bf16 %v59_v16, %v59_v16  ;;  %v4985_v16 = vld [vmem:[#allocation4 + $0x960] ss:$16 sps:$4 sm:$0xff]  }
  0x70   :  { %3254 = vmatprep.subr.bf16.mxu1 %v4840_v21  ;;  %v5628_v21 = vpack.c.bf16 %v61_v17, %v61_v17  ;;  %v4988_v17 = vld [vmem:[#allocation4 + $0xb60] ss:$16 sps:$4 sm:$0xff]  }
  0x72   :  { %3214 = vmatpush1.bf16.msra.mxu0 %v4835_v22  ;;  %v4913_v22 = vld [vmem:[#allocation4 + $0x8e0] ss:$16 sps:$4 sm:$0xff]  }
  0x73   :  { %3255 = vmatpush1.bf16.msra.mxu1 %v4838_v23  ;;  %3215 = vmatprep.subr.bf16.mxu0 %v4843_v24  ;;  %v4916_v23 = vld [vmem:[#allocation4 + $0xae0] ss:$16 sps:$4 sm:$0xff]   ;;  %v4921_v24 = vld [vmem:[#allocation4 + $0x8c4] ss:$16 sps:$4 sm:$0xff]  }
  0x74   :  { %3256 = vmatprep.subr.bf16.mxu1 %v4846_v25  ;;  %v4924_v25 = vld [vmem:[#allocation4 + $0xac4] ss:$16 sps:$4 sm:$0xff]  }
  0x76   :  { %3216 = vmatpush1.bf16.msra.mxu0 %v4841_v26  ;;  %v64_v26 = vld [vmem:[#allocation2 + $0x48] sm:$0xff] }
  0x77   :  { %3257 = vmatpush1.bf16.msra.mxu1 %v4844_v27  ;;  %3217 = vmatprep.subr.bf16.mxu0 %v4849_v28  ;;  %v4919_v27 = vld [vmem:[#allocation4 + $0x8c0] ss:$16 sps:$4 sm:$0xff]  }
  0x78   :  { %3258 = vmatprep.subr.bf16.mxu1 %v4852_v29  ;;  %v4922_v28 = vld [vmem:[#allocation4 + $0xac0] ss:$16 sps:$4 sm:$0xff]   ;;  %v5632_v29 = vpack.c.bf16 %v64_v26, %v64_v26 }
  0x79   :  { %v4997_v26 = vld [vmem:[#allocation4 + $0x920] ss:$16 sps:$4 sm:$0xff]  }
  0x7a   :  { %3218 = vmatpush1.bf16.msra.mxu0 %v4847_v30  ;;  %v66_v30 = vld [vmem:[#allocation2 + $0x58] sm:$0xff] }
  0x7b   :  { %3259 = vmatpush1.bf16.msra.mxu1 %v4850_v31  ;;  %3219 = vmatprep.subr.bf16.mxu0 %v4855_v32  ;;  %v4927_v31 = vld [vmem:[#allocation4 + $0x8a4] ss:$16 sps:$4 sm:$0xff]   ;;  %v5634_v32 = vpack.c.bf16 %v66_v30, %v66_v30 }
  0x7c   :  { %3260 = vmatprep.subr.bf16.mxu1 %v4858_v33  ;;  %v4930_v33 = vld [vmem:[#allocation4 + $0xaa4] ss:$16 sps:$4 sm:$0xff]  }
  0x7d   :  { %v5008_v30 = vld [vmem:[#allocation4 + $0xb04] ss:$16 sps:$4 sm:$0xff]  }
  0x7e   :  { %3220 = vmatpush1.bf16.msra.mxu0 %v4853_v35  ;;  %v4928_v35 = vld [vmem:[#allocation4 + $0xaa0] ss:$16 sps:$4 sm:$0xff]  }
  0x7f   :  { %3261 = vmatpush1.bf16.msra.mxu1 %v4856_v36  ;;  %3221 = vmatprep.subr.bf16.mxu0 %v4861_v39  ;;  %v4933_v36 = vld [vmem:[#allocation4 + $0x884] ss:$16 sps:$4 sm:$0xff]   ;;  %v4931_v39 = vld [vmem:[#allocation4 + $0x880] ss:$16 sps:$4 sm:$0xff]  }
  0x80   :  { %3262 = vmatprep.subr.bf16.mxu1 %v4864_v41  ;;  %v4934_v41 = vld [vmem:[#allocation4 + $0xa80] ss:$16 sps:$4 sm:$0xff]  }
  0x82   :  { %3222 = vmatpush1.bf16.msra.mxu0 %v4859_v42  ;;  %v4939_v42 = vld [vmem:[#allocation4 + $0x864] ss:$16 sps:$4 sm:$0xff]  }
  0x83   :  { %3263 = vmatpush1.bf16.msra.mxu1 %v4862_v43  ;;  %3223 = vmatprep.subr.bf16.mxu0 %v4867_v44  ;;  %v4942_v43 = vld [vmem:[#allocation4 + $0xa64] ss:$16 sps:$4 sm:$0xff]   ;;  %v4937_v44 = vld [vmem:[#allocation4 + $0x860] ss:$16 sps:$4 sm:$0xff]  }
  0x84   :  { %3264 = vmatprep.subr.bf16.mxu1 %v4870_v45  ;;  %v4940_v45 = vld [vmem:[#allocation4 + $0xa60] ss:$16 sps:$4 sm:$0xff]  }
  0x86   :  { %3224 = vmatpush2.bf16.msra.mxu0 %v4865_v46  ;;  %v4945_v46 = vld [vmem:[#allocation4 + $0x844] ss:$16 sps:$4 sm:$0xff]  }
  0x87   :  { %3265 = vmatpush2.bf16.msra.mxu1 %v4868_v47  ;;  %3225 = vmatprep.subr.bf16.mxu0 %v4873_v48  ;;  %v4948_v47 = vld [vmem:[#allocation4 + $0xa44] ss:$16 sps:$4 sm:$0xff]   ;;  %v4943_v48 = vld [vmem:[#allocation4 + $0x840] ss:$16 sps:$4 sm:$0xff]  }
  0x88   :  { %3266 = vmatprep.subr.bf16.mxu1 %v4876_v50  ;;  %v4946_v50 = vld [vmem:[#allocation4 + $0xa40] ss:$16 sps:$4 sm:$0xff]  }
  0x8a   :  { %3226 = vmatpush2.bf16.msra.mxu0 %v4871_v51  ;;  %v4951_v51 = vld [vmem:[#allocation4 + $0x824] ss:$16 sps:$4 sm:$0xff]  }
  0x8b   :  { %3267 = vmatpush2.bf16.msra.mxu1 %v4874_v53  ;;  %3227 = vmatprep.subr.bf16.mxu0 %v4879_v54  ;;  %v4954_v53 = vld [vmem:[#allocation4 + $0xa24] ss:$16 sps:$4 sm:$0xff]   ;;  %v4949_v54 = vld [vmem:[#allocation4 + $0x820] ss:$16 sps:$4 sm:$0xff]  }
  0x8c   :  { %3268 = vmatprep.subr.bf16.mxu1 %v4882_v55  ;;  %v4952_v55 = vld [vmem:[#allocation4 + $0xa20] ss:$16 sps:$4 sm:$0xff]  }
  0x8e   :  { %3228 = vmatpush2.bf16.msra.mxu0 %v4877_v56  ;;  %v4957_v56 = vld [vmem:[#allocation4 + $0x804] ss:$16 sps:$4 sm:$0xff]  }
  0x8f   :  { %3269 = vmatpush2.bf16.msra.mxu1 %v4880_v57  ;;  %3229 = vmatprep.subr.bf16.mxu0 %v4885_v58  ;;  %v4960_v57 = vld [vmem:[#allocation4 + $0xa04] ss:$16 sps:$4 sm:$0xff]   ;;  %v4955_v58 = vld [vmem:[#allocation4 + $0x800] ss:$16 sps:$4 sm:$0xff]  }
  0x90   :  { %3270 = vmatprep.subr.bf16.mxu1 %v4888_v59  ;;  %v4958_v59 = vld [vmem:[#allocation4 + $0xa00] ss:$16 sps:$4 sm:$0xff]  }
  0x92   :  { %3230 = vmatpush2.bf16.msra.mxu0 %v4883_v60  ;;  %v4963_v60 = vld [vmem:[#allocation4 + $0x9e4] ss:$16 sps:$4 sm:$0xff]  }
  0x93   :  { %3271 = vmatpush2.bf16.msra.mxu1 %v4886_v61  ;;  %3231 = vmatprep.subr.bf16.mxu0 %v4891_v62  ;;  %v4966_v61 = vld [vmem:[#allocation4 + $0xbe4] ss:$16 sps:$4 sm:$0xff]   ;;  %v4961_v62 = vld [vmem:[#allocation4 + $0x9e0] ss:$16 sps:$4 sm:$0xff]  }
  0x94   :  { %3272 = vmatprep.subr.bf16.mxu1 %v4894_v63  ;;  %v4964_v63 = vld [vmem:[#allocation4 + $0xbe0] ss:$16 sps:$4 sm:$0xff]  }
  0x96   :  { %3232 = vmatpush2.bf16.msra.mxu0 %v4889_v0  ;;  %v4969_v0 = vld [vmem:[#allocation4 + $0x9c4] ss:$16 sps:$4 sm:$0xff]  }
  0x97   :  { %3273 = vmatpush2.bf16.msra.mxu1 %v4892_v1  ;;  %3233 = vmatprep.subr.bf16.mxu0 %v4897_v2  ;;  %v4972_v1 = vld [vmem:[#allocation4 + $0xbc4] ss:$16 sps:$4 sm:$0xff]   ;;  %v4967_v2 = vld [vmem:[#allocation4 + $0x9c0] ss:$16 sps:$4 sm:$0xff]  }
  0x98   :  { %3274 = vmatprep.subr.bf16.mxu1 %v4900_v3  ;;  %v4970_v3 = vld [vmem:[#allocation4 + $0xbc0] ss:$16 sps:$4 sm:$0xff]  }
  0x9a   :  { %3234 = vmatpush2.bf16.msra.mxu0 %v4895_v4  ;;  %v4975_v4 = vld [vmem:[#allocation4 + $0x9a4] ss:$16 sps:$4 sm:$0xff]  }
  0x9b   :  { %3275 = vmatpush2.bf16.msra.mxu1 %v4898_v5  ;;  %3235 = vmatprep.subr.bf16.mxu0 %v4903_v6  ;;  %v4978_v5 = vld [vmem:[#allocation4 + $0xba4] ss:$16 sps:$4 sm:$0xff]   ;;  %v4973_v6 = vld [vmem:[#allocation4 + $0x9a0] ss:$16 sps:$4 sm:$0xff]  }
  0x9c   :  { %3276 = vmatprep.subr.bf16.mxu1 %v4906_v7  ;;  %v4976_v7 = vld [vmem:[#allocation4 + $0xba0] ss:$16 sps:$4 sm:$0xff]  }
  0x9e   :  { %3236 = vmatpush2.bf16.msra.mxu0 %v4901_v10  ;;  %v4981_v10 = vld [vmem:[#allocation4 + $0x984] ss:$16 sps:$4 sm:$0xff]  }
  0x9f   :  { %3277 = vmatpush2.bf16.msra.mxu1 %v4904_v11  ;;  %3237 = vmatprep.subr.bf16.mxu0 %v4909_v12  ;;  %v4984_v11 = vld [vmem:[#allocation4 + $0xb84] ss:$16 sps:$4 sm:$0xff]   ;;  %v4979_v12 = vld [vmem:[#allocation4 + $0x980] ss:$16 sps:$4 sm:$0xff]  }
  0xa0   :  { %3278 = vmatprep.subr.bf16.mxu1 %v4912_v13  ;;  %v4982_v13 = vld [vmem:[#allocation4 + $0xb80] ss:$16 sps:$4 sm:$0xff]  }
  0xa2   :  { %3238 = vmatpush2.bf16.msra.mxu0 %v4907_v14  ;;  %v4987_v14 = vld [vmem:[#allocation4 + $0x964] ss:$16 sps:$4 sm:$0xff]  }
  0xa3   :  { %3279 = vmatpush2.bf16.msra.mxu1 %v4910_v15  ;;  %3289 = vmatprep.subr.bf16.mxu0 %v4915_v18  ;;  %v4990_v15 = vld [vmem:[#allocation4 + $0xb64] ss:$16 sps:$4 sm:$0xff]  }
  0xa4   :  { %3330 = vmatprep.subr.bf16.mxu1 %v4918_v19  ;;  %v4993_v18 = vld [vmem:[#allocation4 + $0x944] ss:$16 sps:$4 sm:$0xff]  }
  0xa5   :  { %3240 = vmatmul.mubr.bf16.vlgmr.msra.gmra.mxu0 %v5626_v20  ;;  %v4996_v19 = vld [vmem:[#allocation4 + $0xb44] ss:$16 sps:$4 sm:$0xff]  }
  0xa6   :  { %3281 = vmatmul.mubr.bf16.vlgmr.msra.gmra.mxu1 %v5628_v21  ;;  %3290 = vmatpush1.bf16.msra.mxu0 %v4913_v22  ;;  %v4991_v22 = vld [vmem:[#allocation4 + $0x940] ss:$16 sps:$4 sm:$0xff]  }
  0xa7   :  { %3331 = vmatpush1.bf16.msra.mxu1 %v4916_v23  ;;  %3291 = vmatprep.subr.bf16.mxu0 %v4921_v24  ;;  %v4994_v23 = vld [vmem:[#allocation4 + $0xb40] ss:$16 sps:$4 sm:$0xff]   ;;  %v4999_v24 = vld [vmem:[#allocation4 + $0x924] ss:$16 sps:$4 sm:$0xff]  }
  0xa8   :  { %3332 = vmatprep.subr.bf16.mxu1 %v4924_v25  ;;  %3321 = vmatprep.mubr.bf16.mxu0 %v5632_v29  ;;  %v5002_v25 = vld [vmem:[#allocation4 + $0xb24] ss:$16 sps:$4 sm:$0xff]  }
  0xa9   :  { %3362 = vmatprep.mubr.bf16.mxu1 %v5634_v32 }
  0xaa   :  { %3292 = vmatpush1.bf16.msra.mxu0 %v4919_v27  ;;  %v5000_v27 = vld [vmem:[#allocation4 + $0xb20] ss:$16 sps:$4 sm:$0xff]  }
  0xab   :  { %3333 = vmatpush1.bf16.msra.mxu1 %v4922_v28  ;;  %3293 = vmatprep.subr.bf16.mxu0 %v4927_v31  ;;  %v5005_v28 = vld [vmem:[#allocation4 + $0x904] ss:$16 sps:$4 sm:$0xff]   ;;  %v5003_v31 = vld [vmem:[#allocation4 + $0x900] ss:$16 sps:$4 sm:$0xff]  }
  0xac   :  { %3334 = vmatprep.subr.bf16.mxu1 %v4930_v33  ;;  %v5006_v33 = vld [vmem:[#allocation4 + $0xb00] ss:$16 sps:$4 sm:$0xff]  }
  0xae   :  { %3294 = vmatpush1.bf16.msra.mxu0 %v4925_v34  ;;  %v63_v34 = vld [vmem:[#allocation2 + $0x40] sm:$0xff] }
  0xaf   :  { %3335 = vmatpush1.bf16.msra.mxu1 %v4928_v35  ;;  %3295 = vmatprep.subr.bf16.mxu0 %v4933_v36  ;;  %v65_v35 = vld [vmem:[#allocation2 + $0x50] sm:$0xff] }
  0xb0   :  { %3336 = vmatprep.subr.bf16.mxu1 %v4936_v38  ;;  %v5011_v36 = vld [vmem:[#allocation4 + $0xce4] ss:$16 sps:$4 sm:$0xff]  }
  0xb1   :  { %v5014_v38 = vld [vmem:[#allocation4 + $0xee4] ss:$16 sps:$4 sm:$0xff]  }
  0xb2   :  { %3296 = vmatpush1.bf16.msra.mxu0 %v4931_v39  ;;  %v5009_v39 = vld [vmem:[#allocation4 + $0xce0] ss:$16 sps:$4 sm:$0xff]  }
  0xb3   :  { %3337 = vmatpush1.bf16.msra.mxu1 %v4934_v41  ;;  %3297 = vmatprep.subr.bf16.mxu0 %v4939_v42  ;;  %v70_v41 = vld [vmem:[#allocation2 + $0x78] sm:$0xff]  ;;  %v5638_v42 = vpack.c.bf16 %v63_v34, %v63_v34  ;;  %v5074_v34 = vld [vmem:[#allocation4 + $0xf44] ss:$16 sps:$4 sm:$0xff]  }
  0xb4   :  { %3338 = vmatprep.subr.bf16.mxu1 %v4942_v43  ;;  %v5640_v43 = vpack.c.bf16 %v65_v35, %v65_v35  ;;  %v5069_v35 = vld [vmem:[#allocation4 + $0xda0] ss:$16 sps:$4 sm:$0xff]  }
  0xb6   :  { %3298 = vmatpush1.bf16.msra.mxu0 %v4937_v44  ;;  %v68_v44 = vld [vmem:[#allocation2 + $0x68] sm:$0xff] }
  0xb7   :  { %3339 = vmatpush1.bf16.msra.mxu1 %v4940_v45  ;;  %3299 = vmatprep.subr.bf16.mxu0 %v4945_v46  ;;  %v5012_v45 = vld [vmem:[#allocation4 + $0xee0] ss:$16 sps:$4 sm:$0xff]   ;;  %v5017_v46 = vld [vmem:[#allocation4 + $0xcc4] ss:$16 sps:$4 sm:$0xff]  }
  0xb8   :  { %3340 = vmatprep.subr.bf16.mxu1 %v4948_v47  ;;  %v5020_v47 = vld [vmem:[#allocation4 + $0xec4] ss:$16 sps:$4 sm:$0xff]  }
  0xba   :  { %3300 = vmatpush1.bf16.msra.mxu0 %v4943_v48  ;;  %v5642_v48 = vpack.c.bf16 %v70_v41, %v70_v41  ;;  %v5075_v41 = vld [vmem:[#allocation4 + $0xd80] ss:$16 sps:$4 sm:$0xff]  }
  0xbb   :  { %3341 = vmatpush1.bf16.msra.mxu1 %v4946_v50  ;;  %3301 = vmatprep.subr.bf16.mxu0 %v4951_v51  ;;  %v5644_v50 = vpack.c.bf16 %v68_v44, %v68_v44  ;;  %v5015_v51 = vld [vmem:[#allocation4 + $0xcc0] ss:$16 sps:$4 sm:$0xff]  }
  0xbc   :  { %3342 = vmatprep.subr.bf16.mxu1 %v4954_v53  ;;  %v5018_v53 = vld [vmem:[#allocation4 + $0xec0] ss:$16 sps:$4 sm:$0xff]  }
  0xbd   :  { %v5078_v44 = vld [vmem:[#allocation4 + $0xf20] ss:$16 sps:$4 sm:$0xff]  }
  0xbe   :  { %3302 = vmatpush1.bf16.msra.mxu0 %v4949_v54  ;;  %v5023_v54 = vld [vmem:[#allocation4 + $0xca4] ss:$16 sps:$4 sm:$0xff]  }
  0xbf   :  { %3343 = vmatpush1.bf16.msra.mxu1 %v4952_v55  ;;  %3303 = vmatprep.subr.bf16.mxu0 %v4957_v56  ;;  %v5026_v55 = vld [vmem:[#allocation4 + $0xea4] ss:$16 sps:$4 sm:$0xff]   ;;  %v5021_v56 = vld [vmem:[#allocation4 + $0xca0] ss:$16 sps:$4 sm:$0xff]  }
  0xc0   :  { %3344 = vmatprep.subr.bf16.mxu1 %v4960_v57  ;;  %v5024_v57 = vld [vmem:[#allocation4 + $0xea0] ss:$16 sps:$4 sm:$0xff]  }
  0xc2   :  { %3304 = vmatpush1.bf16.msra.mxu0 %v4955_v58  ;;  %v5029_v58 = vld [vmem:[#allocation4 + $0xc84] ss:$16 sps:$4 sm:$0xff]  }
  0xc3   :  { %3345 = vmatpush1.bf16.msra.mxu1 %v4958_v59  ;;  %3305 = vmatprep.subr.bf16.mxu0 %v4963_v60  ;;  %v5032_v59 = vld [vmem:[#allocation4 + $0xe84] ss:$16 sps:$4 sm:$0xff]   ;;  %v5027_v60 = vld [vmem:[#allocation4 + $0xc80] ss:$16 sps:$4 sm:$0xff]  }
  0xc4   :  { %3346 = vmatprep.subr.bf16.mxu1 %v4966_v61  ;;  %v5030_v61 = vld [vmem:[#allocation4 + $0xe80] ss:$16 sps:$4 sm:$0xff]  }
  0xc6   :  { %3306 = vmatpush2.bf16.msra.mxu0 %v4961_v62  ;;  %v5035_v62 = vld [vmem:[#allocation4 + $0xc64] ss:$16 sps:$4 sm:$0xff]  }
  0xc7   :  { %3347 = vmatpush2.bf16.msra.mxu1 %v4964_v63  ;;  %3307 = vmatprep.subr.bf16.mxu0 %v4969_v0  ;;  %v5038_v63 = vld [vmem:[#allocation4 + $0xe64] ss:$16 sps:$4 sm:$0xff]   ;;  %v5033_v0 = vld [vmem:[#allocation4 + $0xc60] ss:$16 sps:$4 sm:$0xff]  }
  0xc8   :  { %3348 = vmatprep.subr.bf16.mxu1 %v4972_v1  ;;  %v5036_v1 = vld [vmem:[#allocation4 + $0xe60] ss:$16 sps:$4 sm:$0xff]  }
  0xca   :  { %3308 = vmatpush2.bf16.msra.mxu0 %v4967_v2  ;;  %v5041_v2 = vld [vmem:[#allocation4 + $0xc44] ss:$16 sps:$4 sm:$0xff]  }
  0xcb   :  { %3349 = vmatpush2.bf16.msra.mxu1 %v4970_v3  ;;  %3309 = vmatprep.subr.bf16.mxu0 %v4975_v4  ;;  %v5044_v3 = vld [vmem:[#allocation4 + $0xe44] ss:$16 sps:$4 sm:$0xff]   ;;  %v5039_v4 = vld [vmem:[#allocation4 + $0xc40] ss:$16 sps:$4 sm:$0xff]  }
  0xcc   :  { %3350 = vmatprep.subr.bf16.mxu1 %v4978_v5  ;;  %v5042_v5 = vld [vmem:[#allocation4 + $0xe40] ss:$16 sps:$4 sm:$0xff]  }
  0xce   :  { %3310 = vmatpush2.bf16.msra.mxu0 %v4973_v6  ;;  %v5047_v6 = vld [vmem:[#allocation4 + $0xc24] ss:$16 sps:$4 sm:$0xff]  }
  0xcf   :  { %3351 = vmatpush2.bf16.msra.mxu1 %v4976_v7  ;;  %3311 = vmatprep.subr.bf16.mxu0 %v4981_v10  ;;  %v5050_v7 = vld [vmem:[#allocation4 + $0xe24] ss:$16 sps:$4 sm:$0xff]   ;;  %v5045_v10 = vld [vmem:[#allocation4 + $0xc20] ss:$16 sps:$4 sm:$0xff]  }
  0xd0   :  { %3352 = vmatprep.subr.bf16.mxu1 %v4984_v11  ;;  %v5048_v11 = vld [vmem:[#allocation4 + $0xe20] ss:$16 sps:$4 sm:$0xff]  }
  0xd2   :  { %3312 = vmatpush2.bf16.msra.mxu0 %v4979_v12  ;;  %v5573_v12 = vmov 65535  }
  0xd3   :  { %3353 = vmatpush2.bf16.msra.mxu1 %v4982_v13  ;;  %3313 = vmatprep.subr.bf16.mxu0 %v4987_v14  ;;  %v3111_v13 = vsel %vm3109_vm1, 4294967295, %v5573_v12  ;;  %v5053_v14 = vld [vmem:[#allocation4 + $0xc04] ss:$16 sps:$4 sm:$0xff]  }
  0xd4   :  { %3354 = vmatprep.subr.bf16.mxu1 %v4990_v15  ;;  %v5056_v15 = vld [vmem:[#allocation4 + $0xe04] ss:$16 sps:$4 sm:$0xff]  }
  0xd6   :  { %3314 = vmatpush2.bf16.msra.mxu0 %v4985_v16  ;;  %v5062_v16 = vld [vmem:[#allocation4 + $0xf84] ss:$16 sps:$4 sm:$0x3f]  }
  0xd7   :  { %3355 = vmatpush2.bf16.msra.mxu1 %v4988_v17  ;;  %3315 = vmatprep.subr.bf16.mxu0 %v4993_v18  ;;  %v5051_v17 = vld [vmem:[#allocation4 + $0xc00] ss:$16 sps:$4 sm:$0xff]   ;;  %v5651_v18 = vsel %vm3110_vm2, %v3111_v13, 0 }
  0xd8   :  { %3356 = vmatprep.subr.bf16.mxu1 %v4996_v19  ;;  %v5054_v19 = vld [vmem:[#allocation4 + $0xe00] ss:$16 sps:$4 sm:$0xff]  }
  0xda   :  { %3316 = vmatpush2.bf16.msra.mxu0 %v4991_v22  ;;  %v5060_v22 = vld [vmem:[#allocation4 + $0xf80] ss:$16 sps:$4 sm:$0x3f]  }
  0xdb   :  { %3357 = vmatpush2.bf16.msra.mxu1 %v4994_v23  ;;  %3317 = vmatprep.subr.bf16.mxu0 %v4999_v24  ;;  %v5059_v23 = vld [vmem:[#allocation4 + $0xde4] ss:$16 sps:$4 sm:$0xff]   ;;  %v3117_v24 = vand.u32 %v5062_v16, %v5651_v18  ;;  %v5108_v16 = vld [vmem:[#allocation4 + $0x2e8] ss:$16 sps:$4 sm:$0xff]  }
  0xdc   :  { %3358 = vmatprep.subr.bf16.mxu1 %v5002_v25  ;;  %v5057_v25 = vld [vmem:[#allocation4 + $0xde0] ss:$16 sps:$4 sm:$0xff]  }
  0xde   :  { %3318 = vmatpush2.bf16.msra.mxu0 %v4997_v26  ;;  %v3114_v26 = vand.u32 %v5060_v22, %v5651_v18 }
  0xdf   :  { %3359 = vmatpush2.bf16.msra.mxu1 %v5000_v27  ;;  %3319 = vmatprep.subr.bf16.mxu0 %v5005_v28  ;;  %v5065_v27 = vld [vmem:[#allocation4 + $0xdc4] ss:$16 sps:$4 sm:$0xff]  }
  0xe0   :  { %3360 = vmatprep.subr.bf16.mxu1 %v5008_v30  ;;  %v5068_v28 = vld [vmem:[#allocation4 + $0xf64] ss:$16 sps:$4 sm:$0xff]   ;;  %v5063_v30 = vld [vmem:[#allocation4 + $0xdc0] ss:$16 sps:$4 sm:$0xff]  }
  0xe2   :  { %3320 = vmatpush2.bf16.msra.mxu0 %v5003_v31  ;;  %v5066_v31 = vld [vmem:[#allocation4 + $0xf60] ss:$16 sps:$4 sm:$0xff]  }
  0xe3   :  { %3361 = vmatpush2.bf16.msra.mxu1 %v5006_v33  ;;  %3371 = vmatprep.subr.bf16.mxu0 %v5011_v36  ;;  %v5071_v33 = vld [vmem:[#allocation4 + $0xda4] ss:$16 sps:$4 sm:$0xff]   ;;  %v5072_v36 = vld [vmem:[#allocation4 + $0xf40] ss:$16 sps:$4 sm:$0xff]  }
  0xe4   :  { %3412 = vmatprep.subr.bf16.mxu1 %v5014_v38  ;;  %v5077_v38 = vld [vmem:[#allocation4 + $0xd84] ss:$16 sps:$4 sm:$0xff]  }
  0xe5   :  { %3322 = vmatmul.mubr.bf16.vlgmr.msra.gmra.mxu0 %v5638_v42 }
  0xe6   :  { %3363 = vmatmul.mubr.bf16.vlgmr.msra.gmra.mxu1 %v5640_v43  ;;  %3372 = vmatpush1.bf16.msra.mxu0 %v5009_v39  ;;  %v5080_v39 = vld [vmem:[#allocation4 + $0xf24] ss:$16 sps:$4 sm:$0xff]  }
  0xe7   :  { %3413 = vmatpush1.bf16.msra.mxu1 %v5012_v45  ;;  %3373 = vmatprep.subr.bf16.mxu0 %v5017_v46  ;;  %v5083_v45 = vld [vmem:[#allocation4 + $0xd64] ss:$16 sps:$4 sm:$0xff]  }
  0xe8   :  { %3414 = vmatprep.subr.bf16.mxu1 %v5020_v47  ;;  %4637 = vmatprep.mubr.msk.bf16.mxu1 %vm3105_vm0, %v5642_v48  ;;  %v5086_v46 = vld [vmem:[#allocation4 + $0xf04] ss:$16 sps:$4 sm:$0xff]   ;;  %v5081_v47 = vld [vmem:[#allocation4 + $0xd60] ss:$16 sps:$4 sm:$0xff]  }
  0xe9   :  { %3403 = vmatprep.mubr.bf16.mxu0 %v5644_v50 }
  0xea   :  { %3374 = vmatpush1.bf16.msra.mxu0 %v5015_v51  ;;  %v5084_v51 = vld [vmem:[#allocation4 + $0xf00] ss:$16 sps:$4 sm:$0xff]  }
  0xeb   :  { %3415 = vmatpush1.bf16.msra.mxu1 %v5018_v53  ;;  %3375 = vmatprep.subr.bf16.mxu0 %v5023_v54  ;;  %v69_v53 = vld [vmem:[#allocation2 + $0x70] sm:$0xff] }
  0xec   :  { %3416 = vmatprep.subr.bf16.mxu1 %v5026_v55  ;;  %v5089_v54 = vld [vmem:[#allocation4 + $0xd44] ss:$16 sps:$4 sm:$0xff]   ;;  %v5092_v55 = vld [vmem:[#allocation4 + $0xec] ss:$16 sps:$4 sm:$0xff]  }
  0xee   :  { %3376 = vmatpush1.bf16.msra.mxu0 %v5021_v56  ;;  %v5087_v56 = vld [vmem:[#allocation4 + $0xd40] ss:$16 sps:$4 sm:$0xff]  }
  0xef   :  { %3417 = vmatpush1.bf16.msra.mxu1 %v5024_v57  ;;  %3377 = vmatprep.subr.bf16.mxu0 %v5029_v58  ;;  %v5655_v57 = vpack.c.bf16 %v69_v53, %v69_v53  ;;  %v5090_v58 = vld [vmem:[#allocation4 + $0xe8] ss:$16 sps:$4 sm:$0xff]  }
  0xf0   :  { %3418 = vmatprep.subr.bf16.mxu1 %v5032_v59  ;;  %v589_v59 = vlaneseq  ;;  %v5126_v53 = vld [vmem:[#allocation4 + $0x288] ss:$16 sps:$4 sm:$0xff]  }
  0xf2   :  { %3378 = vmatpush1.bf16.msra.mxu0 %v5027_v60  ;;  %v5095_v60 = vld [vmem:[#allocation4 + $0xd24] ss:$16 sps:$4 sm:$0xff]  }
  0xf3   :  { %3419 = vmatpush1.bf16.msra.mxu1 %v5030_v61  ;;  %3379 = vmatprep.subr.bf16.mxu0 %v5035_v62  ;;  %v5098_v61 = vld [vmem:[#allocation4 + $0xcc] ss:$16 sps:$4 sm:$0xff]   ;;  %v5093_v62 = vld [vmem:[#allocation4 + $0xd20] ss:$16 sps:$4 sm:$0xff]  }
  0xf4   :  { %3420 = vmatprep.subr.bf16.mxu1 %v5038_v63  ;;  %v5096_v63 = vld [vmem:[#allocation4 + $0xc8] ss:$16 sps:$4 sm:$0xff]  }
  0xf6   :  { %3380 = vmatpush1.bf16.msra.mxu0 %v5033_v0  ;;  %v5658_v0 = vshrl.u32 %v589_v59, 7  ;;  %v5140_v59 = vld [vmem:[#allocation4 + $0x24c] ss:$16 sps:$4 sm:$0xff]  }
  0xf7   :  { %3421 = vmatpush1.bf16.msra.mxu1 %v5036_v1  ;;  %3381 = vmatprep.subr.bf16.mxu0 %v5041_v2  ;;  %v5101_v1 = vld [vmem:[#allocation4 + $0xd04] ss:$16 sps:$4 sm:$0xff]   ;;  %v5104_v2 = vld [vmem:[#allocation4 + $0xac] ss:$16 sps:$4 sm:$0xff]  }
  0xf8   :  { %3422 = vmatprep.subr.bf16.mxu1 %v5044_v3  ;;  %v5099_v3 = vld [vmem:[#allocation4 + $0xd00] ss:$16 sps:$4 sm:$0xff]   ;;  %v595_v12 = vsub.s32 1, %v5658_v0 }
  0xfa   :  { %3382 = vmatpush1.bf16.msra.mxu0 %v5039_v4  ;;  %v5102_v4 = vld [vmem:[#allocation4 + $0xa8] ss:$16 sps:$4 sm:$0xff]  }
  0xfb   :  { %3423 = vmatpush1.bf16.msra.mxu1 %v5042_v5  ;;  %3383 = vmatprep.subr.bf16.mxu0 %v5047_v6  ;;  %v587_v5 = vld [vmem:[#allocation6] sm:$0xf]  ;;  %v591_v6 = vsub.s32 0, %v5658_v0 }
  0xfc   :  { %3424 = vmatprep.subr.bf16.mxu1 %v5050_v7  ;;  %v67_v7 = vld [vmem:[#allocation2 + $0x60] sm:$0xff] }
  0xfd   :  { %v5663_v13 = vpack.c.bf16 %v67_v7, %v67_v7  ;;  %v5155_v7 = vld [vmem:[#allocation4 + $0x18c] ss:$16 sps:$4 sm:$0xff]  }
  0xfe   :  { %3384 = vmatpush1.bf16.msra.mxu0 %v5045_v10  ;;  %v5107_v10 = vld [vmem:[#allocation4 + $0x8c] ss:$16 sps:$4 sm:$0xff]  }
  0xff   :  { %3425 = vmatpush1.bf16.msra.mxu1 %v5048_v11  ;;  %3385 = vmatprep.subr.bf16.mxu0 %v5053_v14  ;;  %v5110_v11 = vld [vmem:[#allocation4 + $0x2ec] ss:$16 sps:$4 sm:$0xff]   ;;  %v5105_v14 = vld [vmem:[#allocation4 + $0x88] ss:$16 sps:$4 sm:$0xff]  }
 0x100   :  { %3426 = vmatprep.subr.bf16.mxu1 %v5056_v15  ;;  %v592_v15 = vrot.slane %v587_v5, %v591_v6  ;;  %v5150_v6 = vld [vmem:[#allocation4 + $0x208] ss:$16 sps:$4 sm:$0xff]  }
 0x102   :  { %3386 = vmatpush1.bf16.msra.mxu0 %v5051_v17  ;;  %v5116_v17 = vld [vmem:[#allocation4 + $0x2cc] ss:$16 sps:$4 sm:$0xff]  }
 0x103   :  { %3427 = vmatpush1.bf16.msra.mxu1 %v5054_v19  ;;  %3387 = vmatprep.subr.bf16.mxu0 %v5059_v23  ;;  %v596_v19 = vrot.slane %v587_v5, %v595_v12  ;;  %v5147_v5 = vld [vmem:[#allocation4 + $0x1a8] ss:$16 sps:$4 sm:$0xff]  }
 0x104   :  { %3434 = vmatprep.subr.bf16.mxu1 %v3117_v24  ;;  %v5111_v24 = vld [vmem:[#allocation4 + $0x68] ss:$16 sps:$4 sm:$0xff]  }
 0x105   :  { %v5156_v12 = vld [vmem:[#allocation4 + $0x3e8] ss:$16 sps:$4 sm:$0xff]  }
 0x106   :  { %3388 = vmatpush2.bf16.msra.mxu0 %v5057_v25 }
 0x107   :  { %3435 = vmatpush2.bf16.msra.mxu1 %v3114_v26  ;;  %3389 = vmatprep.subr.bf16.mxu0 %v5065_v27  ;;  %v5114_v26 = vld [vmem:[#allocation4 + $0x2c8] ss:$16 sps:$4 sm:$0xff]  }
 0x108   :  { %3436 = vmatprep.subr.bf16.mxu1 %v5068_v28 }
 0x10a   :  { %3390 = vmatpush2.bf16.msra.mxu0 %v5063_v30  ;;  %v5119_v30 = vld [vmem:[#allocation4 + $0x4c] ss:$16 sps:$4 sm:$0xff]  }
 0x10b   :  { %3437 = vmatpush2.bf16.msra.mxu1 %v5066_v31  ;;  %3391 = vmatprep.subr.bf16.mxu0 %v5071_v33  ;;  %v5122_v31 = vld [vmem:[#allocation4 + $0x2ac] ss:$16 sps:$4 sm:$0xff]  }
 0x10c   :  { %3438 = vmatprep.subr.bf16.mxu1 %v5074_v34 }
 0x10e   :  { %3392 = vmatpush2.bf16.msra.mxu0 %v5069_v35 }
 0x10f   :  { %3439 = vmatpush2.bf16.msra.mxu1 %v5072_v36  ;;  %3393 = vmatprep.subr.bf16.mxu0 %v5077_v38  ;;  %v5117_v38 = vld [vmem:[#allocation4 + $0x48] ss:$16 sps:$4 sm:$0xff]  }
 0x110   :  { %3440 = vmatprep.subr.bf16.mxu1 %v5080_v39 }
 0x112   :  { %3394 = vmatpush2.bf16.msra.mxu0 %v5075_v41  ;;  %v5120_v41 = vld [vmem:[#allocation4 + $0x2a8] ss:$16 sps:$4 sm:$0xff]  }
 0x113   :  { %3441 = vmatpush2.bf16.msra.mxu1 %v5078_v44  ;;  %3395 = vmatprep.subr.bf16.mxu0 %v5083_v45 }
 0x114   :  { %3442 = vmatprep.subr.bf16.mxu1 %v5086_v46  ;;  %v5125_v46 = vld [vmem:[#allocation4 + $0x2c] ss:$16 sps:$4 sm:$0xff]  }
 0x116   :  { %3396 = vmatpush2.bf16.msra.mxu0 %v5081_v47  ;;  %v5128_v47 = vld [vmem:[#allocation4 + $0x28c] ss:$16 sps:$4 sm:$0xff]  }
 0x117   :  { %3443 = vmatpush2.bf16.msra.mxu1 %v5084_v51  ;;  %3397 = vmatprep.subr.bf16.mxu0 %v5089_v54  ;;  %v5123_v51 = vld [vmem:[#allocation4 + $0x28] ss:$16 sps:$4 sm:$0xff]   ;;  %v5134_v54 = vld [vmem:[#allocation4 + $0x26c] ss:$16 sps:$4 sm:$0xff]  }
 0x118   :  { %3453 = vmatprep.subr.bf16.mxu1 %v5092_v55  ;;  %v5129_v55 = vld [vmem:[#allocation4 + $0x8] ss:$16 sps:$4 sm:$0xff]  }
 0x11a   :  { %3445 = vmatmul.mubr.bf16.vlgmr.msra.gmra.mxu1 %v5655_v57  ;;  %3398 = vmatpush2.bf16.msra.mxu0 %v5087_v56  ;;  %v5132_v56 = vld [vmem:[#allocation4 + $0x268] ss:$16 sps:$4 sm:$0xff]  }
 0x11b   :  { %3454 = vmatpush1.bf16.msra.mxu1 %v5090_v58  ;;  %3399 = vmatprep.subr.bf16.mxu0 %v5095_v60  ;;  %v5137_v58 = vld [vmem:[#allocation4 + $0x1ec] ss:$16 sps:$4 sm:$0xff]   ;;  %v5135_v60 = vld [vmem:[#allocation4 + $0x1e8] ss:$16 sps:$4 sm:$0xff]  }
 0x11c   :  { %3455 = vmatprep.subr.bf16.mxu1 %v5098_v61  ;;  %3485 = vmatprep.mubr.bf16.mxu1 %v5608_v49  ;;  %v5113_v49 = vld [vmem:[#allocation4 + $0x6c] ss:$16 sps:$4 sm:$0xff]   ;;  %v5138_v61 = vld [vmem:[#allocation4 + $0x248] ss:$16 sps:$4 sm:$0xff]  }
 0x11e   :  { %3400 = vmatpush2.bf16.msra.mxu0 %v5093_v62  ;;  %v5143_v62 = vld [vmem:[#allocation4 + $0x1cc] ss:$16 sps:$4 sm:$0xff]  }
 0x11f   :  { %3456 = vmatpush1.bf16.msra.mxu1 %v5096_v63  ;;  %3401 = vmatprep.subr.bf16.mxu0 %v5101_v1  ;;  %v5146_v63 = vld [vmem:[#allocation4 + $0x22c] ss:$16 sps:$4 sm:$0xff]   ;;  %v5141_v1 = vld [vmem:[#allocation4 + $0x1c8] ss:$16 sps:$4 sm:$0xff]  }
 0x120   :  { %3457 = vmatprep.subr.bf16.mxu1 %v5104_v2  ;;  %v5144_v2 = vld [vmem:[#allocation4 + $0x228] ss:$16 sps:$4 sm:$0xff]  }
 0x122   :  { %3402 = vmatpush2.bf16.msra.mxu0 %v5099_v3  ;;  %v5149_v3 = vld [vmem:[#allocation4 + $0x1ac] ss:$16 sps:$4 sm:$0xff]  }
 0x123   :  { %3458 = vmatpush1.bf16.msra.mxu1 %v5102_v4  ;;  %3494 = vmatprep.subr.bf16.mxu0 %v5110_v11  ;;  %v5152_v4 = vld [vmem:[#allocation4 + $0x20c] ss:$16 sps:$4 sm:$0xff]   ;;  %v5153_v11 = vld [vmem:[#allocation4 + $0x188] ss:$16 sps:$4 sm:$0xff]  }
 0x124   :  { %3459 = vmatprep.subr.bf16.mxu1 %v5107_v10  ;;  %v5158_v10 = vld [vmem:[#allocation4 + $0x3ec] ss:$16 sps:$4 sm:$0xff]  }
 0x125   :  { %v3159_v22 = vpop.f32.mrf.mxu0  ;;  %3404 = vmatmul.mubr.bf16.vlgmr.msra.gmra.mxu0 %v5663_v13 }
 0x126   :  { %v3200_v23 = vpop.f32.mrf.mxu1  ;;  %v3160_v25 = vadd.f32 %v3159_v22, %v592_v15  ;;  %3495 = vmatpush1.bf16.msra.mxu0 %v5108_v16  ;;  %3526 = vmatprep.mubr.bf16.mxu0 %v5610_v52  ;;  %v5131_v52 = vld [vmem:[#allocation4 + $0xc] ss:$16 sps:$4 sm:$0xff]   ;;  %v5159_v16 = vld [vmem:[#allocation4 + $0x168] ss:$16 sps:$4 sm:$0xff]  }
 0x127   :  { %3460 = vmatpush1.bf16.msra.mxu1 %v5105_v14  ;;  %v3161_v27 = vpop.f32.mrf.mxu0  ;;  %3496 = vmatprep.subr.bf16.mxu0 %v5116_v17  ;;  %v5161_v14 = vld [vmem:[#allocation4 + $0x16c] ss:$16 sps:$4 sm:$0xff]   ;;  %v5165_v22 = vld [vmem:[#allocation4 + $0x148] ss:$16 sps:$4 sm:$0xff]  }
 0x128   :  { %v3202_v28 = vpop.f32.mrf.mxu1  ;;  %3461 = vmatprep.subr.bf16.mxu1 %v5113_v49  ;;  %v5666_v33 = vadd.f32 %v3200_v23, %v3160_v25  ;;  %v3162_v34 = vadd.f32 %v3161_v27, %v596_v19  ;;  %v5164_v15 = vld [vmem:[#allocation4 + $0x3cc] ss:$16 sps:$4 sm:$0xff]   ;;  %v5162_v49 = vld [vmem:[#allocation4 + $0x3c8] ss:$16 sps:$4 sm:$0xff]  }
 0x129   :  { %v3163_v35 = vpop.f32.mrf.mxu0  ;;  %v5167_v17 = vld [vmem:[#allocation4 + $0x14c] ss:$16 sps:$4 sm:$0xff]   ;;  %v5168_v23 = vld [vmem:[#allocation4 + $0x3a8] ss:$16 sps:$4 sm:$0xff]  }
 0x12a   :  { %v3204_v36 = vpop.f32.mrf.mxu1  ;;  %v5669_v39 = vadd.f32 %v3202_v28, %v3162_v34  ;;  %3497 = vmatpush1.bf16.msra.mxu0 %v5114_v26  ;;  %v5170_v19 = vld [vmem:[#allocation4 + $0x3ac] ss:$16 sps:$4 sm:$0xff]   ;;  %v5171_v26 = vld [vmem:[#allocation4 + $0x128] ss:$16 sps:$4 sm:$0xff]  }
 0x12b   :  { %3462 = vmatpush1.bf16.msra.mxu1 %v5111_v24  ;;  %v3164_v44 = vpop.f32.mrf.mxu0  ;;  %3498 = vmatprep.subr.bf16.mxu0 %v5122_v31  ;;  %v5173_v24 = vld [vmem:[#allocation4 + $0x12c] ss:$16 sps:$4 sm:$0xff]   ;;  %v5174_v27 = vld [vmem:[#allocation4 + $0x388] ss:$16 sps:$4 sm:$0xff]  }
 0x12c   :  { %v3205_v45 = vpop.f32.mrf.mxu1  ;;  %3463 = vmatprep.subr.bf16.mxu1 %v5119_v30  ;;  %v5176_v25 = vld [vmem:[#allocation4 + $0x38c] ss:$16 sps:$4 sm:$0xff]   ;;  %v5177_v31 = vld [vmem:[#allocation4 + $0x108] ss:$16 sps:$4 sm:$0xff]  }
 0x12d   :  { %v5179_v28 = vld [vmem:[#allocation4 + $0x10c] ss:$16 sps:$4 sm:$0xff]   ;;  %v5180_v34 = vld [vmem:[#allocation4 + $0x368] ss:$16 sps:$4 sm:$0xff]  }
 0x12e   :  { %3499 = vmatpush1.bf16.msra.mxu0 %v5120_v41  ;;  %v5182_v30 = vld [vmem:[#allocation4 + $0x36c] ss:$16 sps:$4 sm:$0xff]   ;;  %v5186_v41 = vld [vmem:[#allocation4 + $0x4e8] ss:$16 sps:$4 sm:$0xff]  }
 0x12f   :  { %3464 = vmatpush1.bf16.msra.mxu1 %v5117_v38  ;;  %3500 = vmatprep.subr.bf16.mxu0 %v5128_v47  ;;  %v5185_v35 = vld [vmem:[#allocation4 + $0x34c] ss:$16 sps:$4 sm:$0xff]   ;;  %v5183_v38 = vld [vmem:[#allocation4 + $0x348] ss:$16 sps:$4 sm:$0xff]  }
 0x130   :  { %3465 = vmatprep.subr.bf16.mxu1 %v5125_v46  ;;  %v5188_v36 = vld [vmem:[#allocation4 + $0x4ec] ss:$16 sps:$4 sm:$0xff]   ;;  %v5189_v46 = vld [vmem:[#allocation4 + $0x328] ss:$16 sps:$4 sm:$0xff]  }
 0x131   :  { %v5191_v44 = vld [vmem:[#allocation4 + $0x32c] ss:$16 sps:$4 sm:$0xff]   ;;  %v5192_v47 = vld [vmem:[#allocation4 + $0x4c8] ss:$16 sps:$4 sm:$0xff]  }
 0x132   :  { %3501 = vmatpush1.bf16.msra.mxu0 %v5126_v53  ;;  %v5194_v45 = vld [vmem:[#allocation4 + $0x4cc] ss:$16 sps:$4 sm:$0xff]  }
 0x133   :  { %3466 = vmatpush1.bf16.msra.mxu1 %v5123_v51  ;;  %3502 = vmatprep.subr.bf16.mxu0 %v5134_v54  ;;  %v5197_v51 = vld [vmem:[#allocation4 + $0x30c] ss:$16 sps:$4 sm:$0xff]   ;;  %v5198_v54 = vld [vmem:[#allocation4 + $0x4a8] ss:$16 sps:$4 sm:$0xff]  }
 0x134   :  { %3467 = vmatprep.subr.bf16.mxu1 %v5131_v52  ;;  %v5200_v53 = vld [vmem:[#allocation4 + $0x4ac] ss:$16 sps:$4 sm:$0xff]   ;;  %v5195_v52 = vld [vmem:[#allocation4 + $0x308] ss:$16 sps:$4 sm:$0xff]  }
 0x136   :  { %3503 = vmatpush1.bf16.msra.mxu0 %v5132_v56  ;;  %v5206_v56 = vld [vmem:[#allocation4 + $0x6ec] ss:$16 sps:$4 sm:$0xff]  }
 0x137   :  { %3468 = vmatpush1.bf16.msra.mxu1 %v5129_v55  ;;  %3504 = vmatprep.subr.bf16.mxu0 %v5140_v59  ;;  %v5203_v55 = vld [vmem:[#allocation4 + $0x48c] ss:$16 sps:$4 sm:$0xff]   ;;  %v5204_v59 = vld [vmem:[#allocation4 + $0x6e8] ss:$16 sps:$4 sm:$0xff]  }
 0x138   :  { %3469 = vmatprep.subr.bf16.mxu1 %v5137_v58  ;;  %v5201_v58 = vld [vmem:[#allocation4 + $0x488] ss:$16 sps:$4 sm:$0xff]  }
 0x13a   :  { %3505 = vmatpush1.bf16.msra.mxu0 %v5138_v61  ;;  %v5207_v61 = vld [vmem:[#allocation4 + $0x468] ss:$16 sps:$4 sm:$0xff]  }
 0x13b   :  { %3470 = vmatpush2.bf16.msra.mxu1 %v5135_v60  ;;  %3506 = vmatprep.subr.bf16.mxu0 %v5146_v63  ;;  %v5212_v60 = vld [vmem:[#allocation4 + $0x6cc] ss:$16 sps:$4 sm:$0xff]  }
 0x13c   :  { %3471 = vmatprep.subr.bf16.mxu1 %v5143_v62  ;;  %v5210_v62 = vld [vmem:[#allocation4 + $0x6c8] ss:$16 sps:$4 sm:$0xff]  }
 0x13e   :  { %3507 = vmatpush1.bf16.msra.mxu0 %v5144_v2 }
 0x13f   :  { %3472 = vmatpush2.bf16.msra.mxu1 %v5141_v1  ;;  %3508 = vmatprep.subr.bf16.mxu0 %v5152_v4  ;;  %v5215_v4 = vld [vmem:[#allocation4 + $0x44c] ss:$16 sps:$4 sm:$0xff]  }
 0x140   :  { %3473 = vmatprep.subr.bf16.mxu1 %v5149_v3 }
 0x142   :  { %3509 = vmatpush1.bf16.msra.mxu0 %v5150_v6 }
 0x143   :  { %3474 = vmatpush2.bf16.msra.mxu1 %v5147_v5  ;;  %3510 = vmatprep.subr.bf16.mxu0 %v5158_v10  ;;  %v5218_v5 = vld [vmem:[#allocation4 + $0x6ac] ss:$16 sps:$4 sm:$0xff]   ;;  %v5213_v10 = vld [vmem:[#allocation4 + $0x448] ss:$16 sps:$4 sm:$0xff]  }
 0x144   :  { %3475 = vmatprep.subr.bf16.mxu1 %v5155_v7 }
 0x146   :  { %3511 = vmatpush2.bf16.msra.mxu0 %v5156_v12 }
 0x147   :  { %3476 = vmatpush2.bf16.msra.mxu1 %v5153_v11  ;;  %3512 = vmatprep.subr.bf16.mxu0 %v5164_v15  ;;  %v5216_v11 = vld [vmem:[#allocation4 + $0x6a8] ss:$16 sps:$4 sm:$0xff]  }
 0x148   :  { %3477 = vmatprep.subr.bf16.mxu1 %v5161_v14 }
 0x14a   :  { %3513 = vmatpush2.bf16.msra.mxu0 %v5162_v49  ;;  %v5224_v49 = vld [vmem:[#allocation4 + $0x68c] ss:$16 sps:$4 sm:$0xff]  }
 0x14b   :  { %3478 = vmatpush2.bf16.msra.mxu1 %v5159_v16  ;;  %3514 = vmatprep.subr.bf16.mxu0 %v5170_v19  ;;  %v5221_v16 = vld [vmem:[#allocation4 + $0x42c] ss:$16 sps:$4 sm:$0xff]  }
 0x14c   :  { %3479 = vmatprep.subr.bf16.mxu1 %v5167_v17  ;;  %v5219_v17 = vld [vmem:[#allocation4 + $0x428] ss:$16 sps:$4 sm:$0xff]   ;;  %v5227_v19 = vld [vmem:[#allocation4 + $0x40c] ss:$16 sps:$4 sm:$0xff]  }
 0x14e   :  { %3515 = vmatpush2.bf16.msra.mxu0 %v5168_v23  ;;  %v5228_v23 = vld [vmem:[#allocation4 + $0x668] ss:$16 sps:$4 sm:$0xff]  }
 0x14f   :  { %3480 = vmatpush2.bf16.msra.mxu1 %v5165_v22  ;;  %3516 = vmatprep.subr.bf16.mxu0 %v5176_v25  ;;  %v5225_v22 = vld [vmem:[#allocation4 + $0x408] ss:$16 sps:$4 sm:$0xff]   ;;  %v5236_v25 = vld [vmem:[#allocation4 + $0x64c] ss:$16 sps:$4 sm:$0xff]  }
 0x150   :  { %3481 = vmatprep.subr.bf16.mxu1 %v5173_v24  ;;  %v5233_v24 = vld [vmem:[#allocation4 + $0x5ec] ss:$16 sps:$4 sm:$0xff]  }
 0x152   :  { %3517 = vmatpush2.bf16.msra.mxu0 %v5174_v27  ;;  %v5234_v27 = vld [vmem:[#allocation4 + $0x648] ss:$16 sps:$4 sm:$0xff]  }
 0x153   :  { %3482 = vmatpush2.bf16.msra.mxu1 %v5171_v26  ;;  %3518 = vmatprep.subr.bf16.mxu0 %v5182_v30  ;;  %v5231_v26 = vld [vmem:[#allocation4 + $0x5e8] ss:$16 sps:$4 sm:$0xff]   ;;  %v5242_v30 = vld [vmem:[#allocation4 + $0x62c] ss:$16 sps:$4 sm:$0xff]  }
 0x154   :  { %3483 = vmatprep.subr.bf16.mxu1 %v5179_v28  ;;  %v5239_v28 = vld [vmem:[#allocation4 + $0x5cc] ss:$16 sps:$4 sm:$0xff]  }
 0x156   :  { %3519 = vmatpush2.bf16.msra.mxu0 %v5180_v34  ;;  %v5240_v34 = vld [vmem:[#allocation4 + $0x628] ss:$16 sps:$4 sm:$0xff]  }
 0x157   :  { %3484 = vmatpush2.bf16.msra.mxu1 %v5177_v31  ;;  %3520 = vmatprep.subr.bf16.mxu0 %v5185_v35  ;;  %v5237_v31 = vld [vmem:[#allocation4 + $0x5c8] ss:$16 sps:$4 sm:$0xff]   ;;  %v5245_v35 = vld [vmem:[#allocation4 + $0x5ac] ss:$16 sps:$4 sm:$0xff]  }
 0x158   :  { %3535 = vmatprep.subr.bf16.mxu1 %v5188_v36  ;;  %v5248_v36 = vld [vmem:[#allocation4 + $0x60c] ss:$16 sps:$4 sm:$0xff]  }
 0x15a   :  { %3486 = vmatmul.mubr.bf16.vlgmr.msra.gmra.mxu1 %v5614_v8  ;;  %3521 = vmatpush2.bf16.msra.mxu0 %v5183_v38  ;;  %v5209_v8 = vld [vmem:[#allocation4 + $0x46c] ss:$16 sps:$4 sm:$0xff]   ;;  %v5243_v38 = vld [vmem:[#allocation4 + $0x5a8] ss:$16 sps:$4 sm:$0xff]  }
 0x15b   :  { %3536 = vmatpush1.bf16.msra.mxu1 %v5186_v41  ;;  %3522 = vmatprep.subr.bf16.mxu0 %v5191_v44  ;;  %v5246_v41 = vld [vmem:[#allocation4 + $0x608] ss:$16 sps:$4 sm:$0xff]   ;;  %v5251_v44 = vld [vmem:[#allocation4 + $0x58c] ss:$16 sps:$4 sm:$0xff]  }
 0x15c   :  { %3537 = vmatprep.subr.bf16.mxu1 %v5194_v45  ;;  %3567 = vmatprep.mubr.bf16.mxu1 %v5620_v37  ;;  %v5254_v45 = vld [vmem:[#allocation4 + $0x7ec] ss:$16 sps:$4 sm:$0xff]  }
 0x15e   :  { %3523 = vmatpush2.bf16.msra.mxu0 %v5189_v46  ;;  %v5249_v46 = vld [vmem:[#allocation4 + $0x588] ss:$16 sps:$4 sm:$0xff]  }
 0x15f   :  { %3538 = vmatpush1.bf16.msra.mxu1 %v5192_v47  ;;  %3524 = vmatprep.subr.bf16.mxu0 %v5197_v51  ;;  %v5252_v47 = vld [vmem:[#allocation4 + $0x7e8] ss:$16 sps:$4 sm:$0xff]   ;;  %v5257_v51 = vld [vmem:[#allocation4 + $0x56c] ss:$16 sps:$4 sm:$0xff]  }
 0x160   :  { %3539 = vmatprep.subr.bf16.mxu1 %v5200_v53  ;;  %v5260_v53 = vld [vmem:[#allocation4 + $0x7cc] ss:$16 sps:$4 sm:$0xff]  }
 0x162   :  { %3525 = vmatpush2.bf16.msra.mxu0 %v5195_v52  ;;  %v5255_v52 = vld [vmem:[#allocation4 + $0x568] ss:$16 sps:$4 sm:$0xff]  }
 0x163   :  { %3540 = vmatpush1.bf16.msra.mxu1 %v5198_v54  ;;  %3576 = vmatprep.subr.bf16.mxu0 %v5206_v56  ;;  %v5258_v54 = vld [vmem:[#allocation4 + $0x7c8] ss:$16 sps:$4 sm:$0xff]   ;;  %v5266_v56 = vld [vmem:[#allocation4 + $0x7ac] ss:$16 sps:$4 sm:$0xff]  }
 0x164   :  { %3541 = vmatprep.subr.bf16.mxu1 %v5203_v55  ;;  %v5263_v55 = vld [vmem:[#allocation4 + $0x54c] ss:$16 sps:$4 sm:$0xff]  }
 0x165   :  { %v3241_v63 = vpop.f32.mrf.mxu0  ;;  %3527 = vmatmul.mubr.bf16.vlgmr.msra.gmra.mxu0 %v5616_v9 }
 0x166   :  { %v3282_v1 = vpop.f32.mrf.mxu1  ;;  %v3242_v37 = vadd.f32 %v3241_v63, %v5666_v33  ;;  %3577 = vmatpush1.bf16.msra.mxu0 %v5204_v59  ;;  %3608 = vmatprep.mubr.bf16.mxu0 %v5622_v40  ;;  %v5230_v40 = vld [vmem:[#allocation4 + $0x66c] ss:$16 sps:$4 sm:$0xff]   ;;  %v5264_v59 = vld [vmem:[#allocation4 + $0x7a8] ss:$16 sps:$4 sm:$0xff]  }
 0x167   :  { %3542 = vmatpush1.bf16.msra.mxu1 %v5201_v58  ;;  %v3243_v2 = vpop.f32.mrf.mxu0  ;;  %3578 = vmatprep.subr.bf16.mxu0 %v5212_v60  ;;  %v5261_v58 = vld [vmem:[#allocation4 + $0x548] ss:$16 sps:$4 sm:$0xff]   ;;  %v5272_v60 = vld [vmem:[#allocation4 + $0x78c] ss:$16 sps:$4 sm:$0xff]  }
 0x168   :  { %v3284_v3 = vpop.f32.mrf.mxu1  ;;  %3543 = vmatprep.subr.bf16.mxu1 %v5209_v8  ;;  %v5675_v6 = vadd.f32 %v3282_v1, %v3242_v37  ;;  %v3244_v7 = vadd.f32 %v3243_v2, %v5669_v39  ;;  %v5222_v39 = vld [vmem:[#allocation4 + $0x688] ss:$16 sps:$4 sm:$0xff]   ;;  %v5269_v8 = vld [vmem:[#allocation4 + $0x52c] ss:$16 sps:$4 sm:$0xff]  }
 0x169   :  { %v3245_v12 = vpop.f32.mrf.mxu0  ;;  %v5275_v63 = vld [vmem:[#allocation4 + $0x50c] ss:$16 sps:$4 sm:$0xff]   ;;  %v5273_v37 = vld [vmem:[#allocation4 + $0x508] ss:$16 sps:$4 sm:$0xff]  }
 0x16a   :  { %v3286_v9 = vpop.f32.mrf.mxu1  ;;  %v5679_v14 = vadd.f32 %v3284_v3, %v3244_v7  ;;  %3579 = vmatpush1.bf16.msra.mxu0 %v5210_v62  ;;  %v5270_v62 = vld [vmem:[#allocation4 + $0x788] ss:$16 sps:$4 sm:$0xff]   ;;  %v5278_v1 = vld [vmem:[#allocation4 + $0x76c] ss:$16 sps:$4 sm:$0xff]  }
 0x16b   :  { %3544 = vmatpush1.bf16.msra.mxu1 %v5207_v61  ;;  %v3246_v33 = vpop.f32.mrf.mxu0  ;;  %3580 = vmatprep.subr.bf16.mxu0 %v5218_v5  ;;  %v5267_v61 = vld [vmem:[#allocation4 + $0x528] ss:$16 sps:$4 sm:$0xff]   ;;  %v5281_v3 = vld [vmem:[#allocation4 + $0x74c] ss:$16 sps:$4 sm:$0xff]  }
 0x16c   :  { %v3287_v15 = vpop.f32.mrf.mxu1  ;;  %3545 = vmatprep.subr.bf16.mxu1 %v5215_v4  ;;  %v5276_v2 = vld [vmem:[#allocation4 + $0x768] ss:$16 sps:$4 sm:$0xff]   ;;  %v5284_v4 = vld [vmem:[#allocation4 + $0x8ec] ss:$16 sps:$4 sm:$0xff]  }
 0x16d   :  { %v5279_v5 = vld [vmem:[#allocation4 + $0x748] ss:$16 sps:$4 sm:$0xff]   ;;  %v5293_v33 = vld [vmem:[#allocation4 + $0x70c] ss:$16 sps:$4 sm:$0xff]  }
 0x16e   :  { %3581 = vmatpush1.bf16.msra.mxu0 %v5216_v11  ;;  %v5282_v7 = vld [vmem:[#allocation4 + $0x8e8] ss:$16 sps:$4 sm:$0xff]   ;;  %v5290_v11 = vld [vmem:[#allocation4 + $0x8cc] ss:$16 sps:$4 sm:$0xff]  }
 0x16f   :  { %3546 = vmatpush1.bf16.msra.mxu1 %v5213_v10  ;;  %3582 = vmatprep.subr.bf16.mxu0 %v5224_v49  ;;  %v5287_v10 = vld [vmem:[#allocation4 + $0x72c] ss:$16 sps:$4 sm:$0xff]   ;;  %v5285_v12 = vld [vmem:[#allocation4 + $0x728] ss:$16 sps:$4 sm:$0xff]  }
 0x170   :  { %3547 = vmatprep.subr.bf16.mxu1 %v5221_v16  ;;  %v5288_v9 = vld [vmem:[#allocation4 + $0x8c8] ss:$16 sps:$4 sm:$0xff]   ;;  %v5296_v15 = vld [vmem:[#allocation4 + $0x8ac] ss:$16 sps:$4 sm:$0xff]  }
 0x171   :  { %v5291_v16 = vld [vmem:[#allocation4 + $0x708] ss:$16 sps:$4 sm:$0xff]  }
 0x172   :  { %3583 = vmatpush1.bf16.msra.mxu0 %v5222_v39  ;;  %v5294_v49 = vld [vmem:[#allocation4 + $0x8a8] ss:$16 sps:$4 sm:$0xff]   ;;  %v5302_v39 = vld [vmem:[#allocation4 + $0xaec] ss:$16 sps:$4 sm:$0xff]  }
 0x173   :  { %3548 = vmatpush1.bf16.msra.mxu1 %v5219_v17  ;;  %3584 = vmatprep.subr.bf16.mxu0 %v5230_v40  ;;  %v5299_v17 = vld [vmem:[#allocation4 + $0x88c] ss:$16 sps:$4 sm:$0xff]  }
 0x174   :  { %3549 = vmatprep.subr.bf16.mxu1 %v5227_v19  ;;  %v5300_v19 = vld [vmem:[#allocation4 + $0xae8] ss:$16 sps:$4 sm:$0xff]   ;;  %v5305_v40 = vld [vmem:[#allocation4 + $0x86c] ss:$16 sps:$4 sm:$0xff]  }
 0x176   :  { %3585 = vmatpush1.bf16.msra.mxu0 %v5228_v23 }
 0x177   :  { %3550 = vmatpush1.bf16.msra.mxu1 %v5225_v22  ;;  %3586 = vmatprep.subr.bf16.mxu0 %v5236_v25  ;;  %v5308_v22 = vld [vmem:[#allocation4 + $0xacc] ss:$16 sps:$4 sm:$0xff]   ;;  %v5303_v25 = vld [vmem:[#allocation4 + $0x868] ss:$16 sps:$4 sm:$0xff]  }
 0x178   :  { %3551 = vmatprep.subr.bf16.mxu1 %v5233_v24 }
 0x17a   :  { %3587 = vmatpush1.bf16.msra.mxu0 %v5234_v27 }
 0x17b   :  { %3552 = vmatpush2.bf16.msra.mxu1 %v5231_v26  ;;  %3588 = vmatprep.subr.bf16.mxu0 %v5242_v30  ;;  %v5306_v26 = vld [vmem:[#allocation4 + $0xac8] ss:$16 sps:$4 sm:$0xff]   ;;  %v5311_v30 = vld [vmem:[#allocation4 + $0x84c] ss:$16 sps:$4 sm:$0xff]  }
 0x17c   :  { %3553 = vmatprep.subr.bf16.mxu1 %v5239_v28 }
 0x17e   :  { %3589 = vmatpush1.bf16.msra.mxu0 %v5240_v34 }
 0x17f   :  { %3554 = vmatpush2.bf16.msra.mxu1 %v5237_v31  ;;  %3590 = vmatprep.subr.bf16.mxu0 %v5248_v36  ;;  %v5314_v31 = vld [vmem:[#allocation4 + $0xaac] ss:$16 sps:$4 sm:$0xff]  }
 0x180   :  { %3555 = vmatprep.subr.bf16.mxu1 %v5245_v35 }
 0x182   :  { %3591 = vmatpush1.bf16.msra.mxu0 %v5246_v41  ;;  %v5312_v41 = vld [vmem:[#allocation4 + $0xaa8] ss:$16 sps:$4 sm:$0xff]  }
 0x183   :  { %3556 = vmatpush2.bf16.msra.mxu1 %v5243_v38  ;;  %3592 = vmatprep.subr.bf16.mxu0 %v5254_v45 }
 0x184   :  { %3557 = vmatprep.subr.bf16.mxu1 %v5251_v44 }
 0x186   :  { %3593 = vmatpush2.bf16.msra.mxu0 %v5252_v47  ;;  %v5320_v47 = vld [vmem:[#allocation4 + $0xa8c] ss:$16 sps:$4 sm:$0xff]  }
 0x187   :  { %3558 = vmatpush2.bf16.msra.mxu1 %v5249_v46  ;;  %3594 = vmatprep.subr.bf16.mxu0 %v5260_v53  ;;  %v5317_v46 = vld [vmem:[#allocation4 + $0x82c] ss:$16 sps:$4 sm:$0xff]  }
 0x188   :  { %3559 = vmatprep.subr.bf16.mxu1 %v5257_v51  ;;  %v5315_v51 = vld [vmem:[#allocation4 + $0x828] ss:$16 sps:$4 sm:$0xff]   ;;  %v5326_v53 = vld [vmem:[#allocation4 + $0xa6c] ss:$16 sps:$4 sm:$0xff]  }
 0x18a   :  { %3595 = vmatpush2.bf16.msra.mxu0 %v5258_v54  ;;  %v5324_v54 = vld [vmem:[#allocation4 + $0xa68] ss:$16 sps:$4 sm:$0xff]  }
 0x18b   :  { %3560 = vmatpush2.bf16.msra.mxu1 %v5255_v52  ;;  %3596 = vmatprep.subr.bf16.mxu0 %v5266_v56  ;;  %v5321_v52 = vld [vmem:[#allocation4 + $0x808] ss:$16 sps:$4 sm:$0xff]   ;;  %v5332_v56 = vld [vmem:[#allocation4 + $0xa4c] ss:$16 sps:$4 sm:$0xff]  }
 0x18c   :  { %3561 = vmatprep.subr.bf16.mxu1 %v5263_v55  ;;  %v5329_v55 = vld [vmem:[#allocation4 + $0x9ec] ss:$16 sps:$4 sm:$0xff]  }
 0x18e   :  { %3597 = vmatpush2.bf16.msra.mxu0 %v5264_v59  ;;  %v5330_v59 = vld [vmem:[#allocation4 + $0xa48] ss:$16 sps:$4 sm:$0xff]  }
 0x18f   :  { %3562 = vmatpush2.bf16.msra.mxu1 %v5261_v58  ;;  %3598 = vmatprep.subr.bf16.mxu0 %v5272_v60  ;;  %v5327_v58 = vld [vmem:[#allocation4 + $0x9e8] ss:$16 sps:$4 sm:$0xff]   ;;  %v5338_v60 = vld [vmem:[#allocation4 + $0xa2c] ss:$16 sps:$4 sm:$0xff]  }
 0x190   :  { %3563 = vmatprep.subr.bf16.mxu1 %v5269_v8  ;;  %v5335_v8 = vld [vmem:[#allocation4 + $0x9cc] ss:$16 sps:$4 sm:$0xff]  }
 0x192   :  { %3599 = vmatpush2.bf16.msra.mxu0 %v5270_v62  ;;  %v5336_v62 = vld [vmem:[#allocation4 + $0xa28] ss:$16 sps:$4 sm:$0xff]  }
 0x193   :  { %3564 = vmatpush2.bf16.msra.mxu1 %v5267_v61  ;;  %3600 = vmatprep.subr.bf16.mxu0 %v5278_v1  ;;  %v5333_v61 = vld [vmem:[#allocation4 + $0x9c8] ss:$16 sps:$4 sm:$0xff]   ;;  %v5344_v1 = vld [vmem:[#allocation4 + $0xa0c] ss:$16 sps:$4 sm:$0xff]  }
 0x194   :  { %3565 = vmatprep.subr.bf16.mxu1 %v5275_v63  ;;  %v5341_v63 = vld [vmem:[#allocation4 + $0x9ac] ss:$16 sps:$4 sm:$0xff]  }
 0x196   :  { %3601 = vmatpush2.bf16.msra.mxu0 %v5276_v2  ;;  %v5342_v2 = vld [vmem:[#allocation4 + $0xa08] ss:$16 sps:$4 sm:$0xff]  }
 0x197   :  { %3566 = vmatpush2.bf16.msra.mxu1 %v5273_v37  ;;  %3602 = vmatprep.subr.bf16.mxu0 %v5281_v3  ;;  %v5339_v37 = vld [vmem:[#allocation4 + $0x9a8] ss:$16 sps:$4 sm:$0xff]   ;;  %v5347_v3 = vld [vmem:[#allocation4 + $0x98c] ss:$16 sps:$4 sm:$0xff]  }
 0x198   :  { %3617 = vmatprep.subr.bf16.mxu1 %v5284_v4  ;;  %v5350_v4 = vld [vmem:[#allocation4 + $0xbec] ss:$16 sps:$4 sm:$0xff]  }
 0x19a   :  { %3568 = vmatmul.mubr.bf16.vlgmr.msra.gmra.mxu1 %v5626_v20  ;;  %3603 = vmatpush2.bf16.msra.mxu0 %v5279_v5  ;;  %v5297_v20 = vld [vmem:[#allocation4 + $0x888] ss:$16 sps:$4 sm:$0xff]  }
 0x19b   :  { %3618 = vmatpush1.bf16.msra.mxu1 %v5282_v7  ;;  %3604 = vmatprep.subr.bf16.mxu0 %v5287_v10  ;;  %v5345_v5 = vld [vmem:[#allocation4 + $0x988] ss:$16 sps:$4 sm:$0xff]   ;;  %v5353_v10 = vld [vmem:[#allocation4 + $0x96c] ss:$16 sps:$4 sm:$0xff]  }
 0x19c   :  { %3619 = vmatprep.subr.bf16.mxu1 %v5290_v11  ;;  %3649 = vmatprep.mubr.bf16.mxu1 %v5632_v29  ;;  %v5348_v7 = vld [vmem:[#allocation4 + $0xbe8] ss:$16 sps:$4 sm:$0xff]   ;;  %v5356_v11 = vld [vmem:[#allocation4 + $0xbcc] ss:$16 sps:$4 sm:$0xff]  }
 0x19e   :  { %3605 = vmatpush2.bf16.msra.mxu0 %v5285_v12  ;;  %v5351_v12 = vld [vmem:[#allocation4 + $0x968] ss:$16 sps:$4 sm:$0xff]  }
 0x19f   :  { %3620 = vmatpush1.bf16.msra.mxu1 %v5288_v9  ;;  %3606 = vmatprep.subr.bf16.mxu0 %v5293_v33  ;;  %v5354_v9 = vld [vmem:[#allocation4 + $0xbc8] ss:$16 sps:$4 sm:$0xff]   ;;  %v5359_v33 = vld [vmem:[#allocation4 + $0x94c] ss:$16 sps:$4 sm:$0xff]  }
 0x1a0   :  { %3621 = vmatprep.subr.bf16.mxu1 %v5296_v15  ;;  %v5362_v15 = vld [vmem:[#allocation4 + $0xbac] ss:$16 sps:$4 sm:$0xff]  }
 0x1a2   :  { %3607 = vmatpush2.bf16.msra.mxu0 %v5291_v16  ;;  %v5357_v16 = vld [vmem:[#allocation4 + $0x948] ss:$16 sps:$4 sm:$0xff]  }
 0x1a3   :  { %3622 = vmatpush1.bf16.msra.mxu1 %v5294_v49  ;;  %3658 = vmatprep.subr.bf16.mxu0 %v5302_v39  ;;  %v5360_v49 = vld [vmem:[#allocation4 + $0xba8] ss:$16 sps:$4 sm:$0xff]   ;;  %v5368_v39 = vld [vmem:[#allocation4 + $0xb8c] ss:$16 sps:$4 sm:$0xff]  }
 0x1a4   :  { %3623 = vmatprep.subr.bf16.mxu1 %v5299_v17  ;;  %v5365_v17 = vld [vmem:[#allocation4 + $0x92c] ss:$16 sps:$4 sm:$0xff]  }
 0x1a5   :  { %v3323_v23 = vpop.f32.mrf.mxu0  ;;  %3609 = vmatmul.mubr.bf16.vlgmr.msra.gmra.mxu0 %v5628_v21 }
 0x1a6   :  { %v3364_v24 = vpop.f32.mrf.mxu1  ;;  %v3324_v29 = vadd.f32 %v3323_v23, %v5675_v6  ;;  %3659 = vmatpush1.bf16.msra.mxu0 %v5300_v19  ;;  %3690 = vmatprep.mubr.bf16.mxu0 %v5634_v32  ;;  %v5309_v6 = vld [vmem:[#allocation4 + $0x848] ss:$16 sps:$4 sm:$0xff]   ;;  %v5323_v32 = vld [vmem:[#allocation4 + $0x80c] ss:$16 sps:$4 sm:$0xff]  }
 0x1a7   :  { %3624 = vmatpush1.bf16.msra.mxu1 %v5297_v20  ;;  %v3325_v27 = vpop.f32.mrf.mxu0  ;;  %3660 = vmatprep.subr.bf16.mxu0 %v5308_v22  ;;  %v5363_v20 = vld [vmem:[#allocation4 + $0x928] ss:$16 sps:$4 sm:$0xff]   ;;  %v5374_v22 = vld [vmem:[#allocation4 + $0xb6c] ss:$16 sps:$4 sm:$0xff]  }
 0x1a8   :  { %v3366_v28 = vpop.f32.mrf.mxu1  ;;  %3625 = vmatprep.subr.bf16.mxu1 %v5305_v40  ;;  %v5685_v34 = vadd.f32 %v3364_v24, %v3324_v29  ;;  %v3326_v35 = vadd.f32 %v3325_v27, %v5679_v14  ;;  %v5318_v14 = vld [vmem:[#allocation4 + $0xa88] ss:$16 sps:$4 sm:$0xff]   ;;  %v5371_v40 = vld [vmem:[#allocation4 + $0x90c] ss:$16 sps:$4 sm:$0xff]  }
 0x1a9   :  { %v3327_v36 = vpop.f32.mrf.mxu0  ;;  %v5366_v19 = vld [vmem:[#allocation4 + $0xb88] ss:$16 sps:$4 sm:$0xff]   ;;  %v5377_v29 = vld [vmem:[#allocation4 + $0xb4c] ss:$16 sps:$4 sm:$0xff]  }
 0x1aa   :  { %v3368_v21 = vpop.f32.mrf.mxu1  ;;  %v5689_v38 = vadd.f32 %v3366_v28, %v3326_v35  ;;  %3661 = vmatpush1.bf16.msra.mxu0 %v5306_v26  ;;  %v5369_v23 = vld [vmem:[#allocation4 + $0x908] ss:$16 sps:$4 sm:$0xff]   ;;  %v5383_v28 = vld [vmem:[#allocation4 + $0xb2c] ss:$16 sps:$4 sm:$0xff]  }
 0x1ab   :  { %3626 = vmatpush1.bf16.msra.mxu1 %v5303_v25  ;;  %v3328_v44 = vpop.f32.mrf.mxu0  ;;  %3662 = vmatprep.subr.bf16.mxu0 %v5314_v31  ;;  %v5372_v24 = vld [vmem:[#allocation4 + $0xb68] ss:$16 sps:$4 sm:$0xff]   ;;  %v5380_v25 = vld [vmem:[#allocation4 + $0xcec] ss:$16 sps:$4 sm:$0xff]  }
 0x1ac   :  { %v3369_v45 = vpop.f32.mrf.mxu1  ;;  %3627 = vmatprep.subr.bf16.mxu1 %v5311_v30  ;;  %v5375_v26 = vld [vmem:[#allocation4 + $0xb48] ss:$16 sps:$4 sm:$0xff]   ;;  %v5386_v30 = vld [vmem:[#allocation4 + $0xccc] ss:$16 sps:$4 sm:$0xff]  }
 0x1ad   :  { %v5378_v27 = vld [vmem:[#allocation4 + $0xce8] ss:$16 sps:$4 sm:$0xff]  }
 0x1ae   :  { %3663 = vmatpush1.bf16.msra.mxu0 %v5312_v41  ;;  %v5381_v35 = vld [vmem:[#allocation4 + $0xb28] ss:$16 sps:$4 sm:$0xff]   ;;  %v5392_v41 = vld [vmem:[#allocation4 + $0xcac] ss:$16 sps:$4 sm:$0xff]  }
 0x1af   :  { %3628 = vmatpush1.bf16.msra.mxu1 %v5309_v6  ;;  %3664 = vmatprep.subr.bf16.mxu0 %v5320_v47  ;;  %v5384_v36 = vld [vmem:[#allocation4 + $0xcc8] ss:$16 sps:$4 sm:$0xff]   ;;  %v5389_v6 = vld [vmem:[#allocation4 + $0xb0c] ss:$16 sps:$4 sm:$0xff]  }
 0x1b0   :  { %3629 = vmatprep.subr.bf16.mxu1 %v5317_v46  ;;  %v5387_v45 = vld [vmem:[#allocation4 + $0xb08] ss:$16 sps:$4 sm:$0xff]  }
 0x1b1   :  { %v5390_v46 = vld [vmem:[#allocation4 + $0xca8] ss:$16 sps:$4 sm:$0xff]  }
 0x1b2   :  { %3665 = vmatpush1.bf16.msra.mxu0 %v5318_v14  ;;  %v5393_v14 = vld [vmem:[#allocation4 + $0xc88] ss:$16 sps:$4 sm:$0xff]  }
 0x1b3   :  { %3630 = vmatpush1.bf16.msra.mxu1 %v5315_v51  ;;  %3666 = vmatprep.subr.bf16.mxu0 %v5326_v53  ;;  %v5398_v51 = vld [vmem:[#allocation4 + $0xeec] ss:$16 sps:$4 sm:$0xff]  }
 0x1b4   :  { %3631 = vmatprep.subr.bf16.mxu1 %v5323_v32  ;;  %v5396_v32 = vld [vmem:[#allocation4 + $0xee8] ss:$16 sps:$4 sm:$0xff]   ;;  %v5401_v53 = vld [vmem:[#allocation4 + $0xc6c] ss:$16 sps:$4 sm:$0xff]  }
 0x1b6   :  { %3667 = vmatpush1.bf16.msra.mxu0 %v5324_v54 }
 0x1b7   :  { %3632 = vmatpush1.bf16.msra.mxu1 %v5321_v52  ;;  %3668 = vmatprep.subr.bf16.mxu0 %v5332_v56  ;;  %v5404_v52 = vld [vmem:[#allocation4 + $0xecc] ss:$16 sps:$4 sm:$0xff]   ;;  %v5402_v56 = vld [vmem:[#allocation4 + $0xec8] ss:$16 sps:$4 sm:$0xff]  }
 0x1b8   :  { %3633 = vmatprep.subr.bf16.mxu1 %v5329_v55  ;;  %v5399_v55 = vld [vmem:[#allocation4 + $0xc68] ss:$16 sps:$4 sm:$0xff]  }
 0x1ba   :  { %3669 = vmatpush1.bf16.msra.mxu0 %v5330_v59  ;;  %v5407_v59 = vld [vmem:[#allocation4 + $0xc4c] ss:$16 sps:$4 sm:$0xff]  }
 0x1bb   :  { %3634 = vmatpush2.bf16.msra.mxu1 %v5327_v58  ;;  %3670 = vmatprep.subr.bf16.mxu0 %v5338_v60 }
 0x1bc   :  { %3635 = vmatprep.subr.bf16.mxu1 %v5335_v8  ;;  %v5410_v8 = vld [vmem:[#allocation4 + $0xeac] ss:$16 sps:$4 sm:$0xff]  }
 0x1be   :  { %3671 = vmatpush1.bf16.msra.mxu0 %v5336_v62 }
 0x1bf   :  { %3636 = vmatpush2.bf16.msra.mxu1 %v5333_v61  ;;  %3672 = vmatprep.subr.bf16.mxu0 %v5344_v1  ;;  %v5416_v1 = vld [vmem:[#allocation4 + $0xe8c] ss:$16 sps:$4 sm:$0xff]  }
 0x1c0   :  { %3637 = vmatprep.subr.bf16.mxu1 %v5341_v63  ;;  %v5413_v63 = vld [vmem:[#allocation4 + $0xc2c] ss:$16 sps:$4 sm:$0xff]  }
 0x1c2   :  { %3673 = vmatpush1.bf16.msra.mxu0 %v5342_v2  ;;  %v5414_v2 = vld [vmem:[#allocation4 + $0xe88] ss:$16 sps:$4 sm:$0xff]  }
 0x1c3   :  { %3638 = vmatpush2.bf16.msra.mxu1 %v5339_v37  ;;  %3674 = vmatprep.subr.bf16.mxu0 %v5350_v4  ;;  %v5411_v37 = vld [vmem:[#allocation4 + $0xc28] ss:$16 sps:$4 sm:$0xff]   ;;  %v5422_v4 = vld [vmem:[#allocation4 + $0xe6c] ss:$16 sps:$4 sm:$0xff]  }
 0x1c4   :  { %3639 = vmatprep.subr.bf16.mxu1 %v5347_v3  ;;  %v5419_v3 = vld [vmem:[#allocation4 + $0xc0c] ss:$16 sps:$4 sm:$0xff]  }
 0x1c6   :  { %3675 = vmatpush2.bf16.msra.mxu0 %v5348_v7  ;;  %v5425_v7 = vld [vmem:[#allocation4 + $0xdec] ss:$16 sps:$4 sm:$0xff]  }
 0x1c7   :  { %3640 = vmatpush2.bf16.msra.mxu1 %v5345_v5  ;;  %3676 = vmatprep.subr.bf16.mxu0 %v5356_v11  ;;  %v5420_v5 = vld [vmem:[#allocation4 + $0xe68] ss:$16 sps:$4 sm:$0xff]  }
 0x1c8   :  { %3641 = vmatprep.subr.bf16.mxu1 %v5353_v10  ;;  %v5428_v10 = vld [vmem:[#allocation4 + $0xe4c] ss:$16 sps:$4 sm:$0xff]   ;;  %v5423_v11 = vld [vmem:[#allocation4 + $0xde8] ss:$16 sps:$4 sm:$0xff]  }
 0x1ca   :  { %3677 = vmatpush2.bf16.msra.mxu0 %v5354_v9  ;;  %v5431_v9 = vld [vmem:[#allocation4 + $0xdcc] ss:$16 sps:$4 sm:$0xff]  }
 0x1cb   :  { %3642 = vmatpush2.bf16.msra.mxu1 %v5351_v12  ;;  %3678 = vmatprep.subr.bf16.mxu0 %v5362_v15  ;;  %v5426_v12 = vld [vmem:[#allocation4 + $0xe48] ss:$16 sps:$4 sm:$0xff]  }
 0x1cc   :  { %3643 = vmatprep.subr.bf16.mxu1 %v5359_v33  ;;  %v5434_v33 = vld [vmem:[#allocation4 + $0xe2c] ss:$16 sps:$4 sm:$0xff]   ;;  %v5429_v15 = vld [vmem:[#allocation4 + $0xdc8] ss:$16 sps:$4 sm:$0xff]  }
 0x1ce   :  { %3679 = vmatpush2.bf16.msra.mxu0 %v5360_v49  ;;  %v5437_v49 = vld [vmem:[#allocation4 + $0xdac] ss:$16 sps:$4 sm:$0xff]  }
 0x1cf   :  { %3644 = vmatpush2.bf16.msra.mxu1 %v5357_v16  ;;  %3680 = vmatprep.subr.bf16.mxu0 %v5368_v39  ;;  %v5432_v16 = vld [vmem:[#allocation4 + $0xe28] ss:$16 sps:$4 sm:$0xff]   ;;  %v5446_v39 = vld [vmem:[#allocation4 + $0xf8c] ss:$16 sps:$4 sm:$0x3f]  }
 0x1d0   :  { %3645 = vmatprep.subr.bf16.mxu1 %v5365_v17  ;;  %v5440_v17 = vld [vmem:[#allocation4 + $0xe0c] ss:$16 sps:$4 sm:$0xff]  }
 0x1d2   :  { %3681 = vmatpush2.bf16.msra.mxu0 %v5366_v19  ;;  %v5438_v19 = vld [vmem:[#allocation4 + $0xe08] ss:$16 sps:$4 sm:$0xff]  }
 0x1d3   :  { %3646 = vmatpush2.bf16.msra.mxu1 %v5363_v20  ;;  %3682 = vmatprep.subr.bf16.mxu0 %v5374_v22  ;;  %v5435_v20 = vld [vmem:[#allocation4 + $0xda8] ss:$16 sps:$4 sm:$0xff]   ;;  %v5443_v22 = vld [vmem:[#allocation4 + $0xd8c] ss:$16 sps:$4 sm:$0xff]  }
 0x1d4   :  { %3647 = vmatprep.subr.bf16.mxu1 %v5371_v40  ;;  %v5444_v40 = vld [vmem:[#allocation4 + $0xf88] ss:$16 sps:$4 sm:$0x3f]  }
 0x1d6   :  { %3683 = vmatpush2.bf16.msra.mxu0 %v5372_v24  ;;  %v5441_v24 = vld [vmem:[#allocation4 + $0xd88] ss:$16 sps:$4 sm:$0xff]  }
 0x1d7   :  { %3648 = vmatpush2.bf16.msra.mxu1 %v5369_v23  ;;  %3684 = vmatprep.subr.bf16.mxu0 %v5377_v29  ;;  %v3123_v23 = vand.u32 %v5446_v39, %v5651_v18  ;;  %v3120_v29 = vand.u32 %v5444_v40, %v5651_v18  ;;  %v5461_v18 = vld [vmem:[#allocation4 + $0xd2c] ss:$16 sps:$4 sm:$0xff]   ;;  %v5490_v39 = vld [vmem:[%s5815_s3 + $0xb0] sm:$0xff]  }
 0x1d8   :  { %3699 = vmatprep.subr.bf16.mxu1 %v5380_v25  ;;  %v5449_v25 = vld [vmem:[#allocation4 + $0xd6c] ss:$16 sps:$4 sm:$0xff]  }
 0x1d9   :  { %v5491_v40 = vld [vmem:[%s5815_s3 + $0xe8] sm:$0xff]  }
 0x1da   :  { %v3446_v31 = vpop.f32.mrf.mxu1  ;;  %3650 = vmatmul.mubr.bf16.vlgmr.msra.gmra.mxu1 %v5638_v42  ;;  %3685 = vmatpush2.bf16.msra.mxu0 %v5375_v26  ;;  %v5395_v42 = vld [vmem:[#allocation4 + $0xc8c] ss:$16 sps:$4 sm:$0xff]  }
 0x1db   :  { %3700 = vmatpush1.bf16.msra.mxu1 %v5378_v27  ;;  %3686 = vmatprep.subr.bf16.mxu0 %v5383_v28  ;;  %v5452_v26 = vld [vmem:[#allocation4 + $0xf6c] ss:$16 sps:$4 sm:$0xff]   ;;  %v5447_v27 = vld [vmem:[#allocation4 + $0xd68] ss:$16 sps:$4 sm:$0xff]  }
 0x1dc   :  { %v5692_v21 = vpop.f32.mrf.mxu1  ;;  %3701 = vmatprep.subr.bf16.mxu1 %v5386_v30  ;;  %3731 = vmatprep.mubr.bf16.mxu1 %v5644_v50  ;;  %v5450_v28 = vld [vmem:[#allocation4 + $0xf68] ss:$16 sps:$4 sm:$0xff]   ;;  %v5455_v30 = vld [vmem:[#allocation4 + $0xd4c] ss:$16 sps:$4 sm:$0xff]  }
 0x1de   :  { %v3450_v44 = vpop.f32.mrf.mxu1  ;;  %3687 = vmatpush2.bf16.msra.mxu0 %v5381_v35 }
 0x1df   :  { %3702 = vmatpush1.bf16.msra.mxu1 %v5384_v36  ;;  %3688 = vmatprep.subr.bf16.mxu0 %v5389_v6  ;;  %v5453_v36 = vld [vmem:[#allocation4 + $0xd48] ss:$16 sps:$4 sm:$0xff]  }
 0x1e0   :  { %v3451_v47 = vpop.f32.mrf.mxu1  ;;  %3703 = vmatprep.subr.bf16.mxu1 %v5392_v41  ;;  %v5456_v6 = vld [vmem:[#allocation4 + $0xf48] ss:$16 sps:$4 sm:$0xff]   ;;  %v5464_v41 = vld [vmem:[#allocation4 + $0xf2c] ss:$16 sps:$4 sm:$0xff]  }
 0x1e1   :  { %v5467_v47 = vld [vmem:[#allocation4 + $0xd0c] ss:$16 sps:$4 sm:$0xff]  }
 0x1e2   :  { %3689 = vmatpush2.bf16.msra.mxu0 %v5387_v45  ;;  %v5459_v45 = vld [vmem:[#allocation4 + $0xd28] ss:$16 sps:$4 sm:$0xff]  }
 0x1e3   :  { %3704 = vmatpush1.bf16.msra.mxu1 %v5390_v46  ;;  %3740 = vmatprep.subr.bf16.mxu0 %v5398_v51  ;;  %v5462_v46 = vld [vmem:[#allocation4 + $0xf28] ss:$16 sps:$4 sm:$0xff]  }
 0x1e4   :  { %3705 = vmatprep.subr.bf16.mxu1 %v5395_v42  ;;  %v5470_v42 = vld [vmem:[#allocation4 + $0xf0c] ss:$16 sps:$4 sm:$0xff]  }
 0x1e5   :  { %v3405_v54 = vpop.f32.mrf.mxu0  ;;  %3691 = vmatmul.mubr.bf16.vlgmr.msra.gmra.mxu0 %v5640_v43  ;;  %v5405_v43 = vld [vmem:[#allocation4 + $0xc48] ss:$16 sps:$4 sm:$0xff]  }
 0x1e6   :  { %v3406_v50 = vadd.f32 %v3405_v54, %v5685_v34  ;;  %3741 = vmatpush1.bf16.msra.mxu0 %v5396_v32  ;;  %4638 = vmatprep.mubr.msk.bf16.mxu0 %vm3105_vm0, %v5642_v48  ;;  %v5408_v34 = vld [vmem:[#allocation4 + $0xea8] ss:$16 sps:$4 sm:$0xff]  }
 0x1e7   :  { %3706 = vmatpush1.bf16.msra.mxu1 %v5393_v14  ;;  %v5697_v58 = vpop.f32.mrf.mxu0  ;;  %3742 = vmatprep.subr.bf16.mxu0 %v5404_v52  ;;  %v5417_v48 = vld [vmem:[#allocation4 + $0xc08] ss:$16 sps:$4 sm:$0xff]   ;;  %v5473_v52 = vld [vmem:[%s5815_s3 + $0x70] sm:$0xff]  }
 0x1e8   :  { %3707 = vmatprep.subr.bf16.mxu1 %v5401_v53  ;;  %v5699_v60 = vadd.f32 %v3446_v31, %v3406_v50  ;;  %v5458_v31 = vld [vmem:[#allocation4 + $0xf4c] ss:$16 sps:$4 sm:$0xff]   ;;  %v3408_v35 = vadd.f32 %v5697_v58, %v5689_v38  ;;  %v5465_v38 = vld [vmem:[#allocation4 + $0xd08] ss:$16 sps:$4 sm:$0xff]  }
 0x1e9   :  { %v3409_v61 = vpop.f32.mrf.mxu0  ;;  %v5468_v14 = vld [vmem:[#allocation4 + $0xf08] ss:$16 sps:$4 sm:$0xff]  }
 0x1ea   :  { %3743 = vmatpush1.bf16.msra.mxu0 %v5402_v56  ;;  %v3449_v44 = vadd.f32 %v5692_v21, %v3408_v35  ;;  %v5471_v32 = vld [vmem:[%s5815_s3 + $0x78] sm:$0xff]   ;;  %v5475_v58 = vld [vmem:[%s5815_s3 + $0x68] sm:$0xff]   ;;  %v603_v61 = vsub.s32 3, %v5658_v0  ;;  %v5498_v35 = vld [vmem:[%s5815_s3 + $0x90] sm:$0xff]  }
 0x1eb   :  { %3708 = vmatpush1.bf16.msra.mxu1 %v5399_v55  ;;  %v3410_v62 = vpop.f32.mrf.mxu0  ;;  %3744 = vmatprep.subr.bf16.mxu0 %v5410_v8  ;;  %v5472_v53 = vld [vmem:[%s5815_s3 + $0x38] sm:$0xff]   ;;  %v5474_v55 = vld [vmem:[%s5815_s3 + $0x30] sm:$0xff]  }
 0x1ec   :  { %3709 = vmatprep.subr.bf16.mxu1 %v5407_v59  ;;  %v3782_v51 = vmax.f32 %v3449_v44, 0.0  ;;  %v599_v59 = vsub.s32 2, %v5658_v0  ;;  %v5479_v0 = vld [vmem:[%s5815_s3 + $0x58] sm:$0xff]   ;;  %v5500_v44 = vld [vmem:[%s5815_s3 + $0x88] sm:$0xff]  }
 0x1ee   :  { %3745 = vmatpush1.bf16.msra.mxu0 %v5408_v34  ;;  %v3786_v21 = vmul.f32 %v3782_v51, %v3782_v51  ;;  %v5503_v34 = vld [vmem:[#allocation6] sm:$0xf] }
 0x1ef   :  { %3710 = vmatpush1.bf16.msra.mxu1 %v5405_v43  ;;  %3746 = vmatprep.subr.bf16.mxu0 %v5416_v1  ;;  %v5477_v43 = vld [vmem:[%s5815_s3 + $0x60] sm:$0xff]   ;;  %v600_v62 = vrot.slane %v5503_v34, %v599_v59 }
 0x1f0   :  { %3711 = vmatprep.subr.bf16.mxu1 %v5413_v63  ;;  %v3790_v54 = vpack.c.bf16 %v3786_v21, %v3786_v21  ;;  %v604_v63 = vrot.slane %v5503_v34, %v603_v61  ;;  %v5478_v1 = vld [vmem:[%s5815_s3 + $0x20] sm:$0xff]  }
 0x1f2   :  { %3747 = vmatpush1.bf16.msra.mxu0 %v5414_v2 }
 0x1f3   :  { %3712 = vmatpush1.bf16.msra.mxu1 %v5411_v37  ;;  %3748 = vmatprep.subr.bf16.mxu0 %v5422_v4 }
 0x1f4   :  { %3713 = vmatprep.subr.bf16.mxu1 %v5419_v3 }
 0x1f6   :  { %3749 = vmatpush1.bf16.msra.mxu0 %v5420_v5 }
 0x1f7   :  { %3714 = vmatpush1.bf16.msra.mxu1 %v5417_v48  ;;  %3750 = vmatprep.subr.bf16.mxu0 %v5428_v10  ;;  %v5480_v48 = vld [vmem:[%s5815_s3 + $0x18] sm:$0xff]  }
 0x1f8   :  { %3715 = vmatprep.subr.bf16.mxu1 %v5425_v7  ;;  %v5481_v7 = vld [vmem:[%s5815_s3 + $0x50] sm:$0xff]  }
 0x1fa   :  { %3751 = vmatpush1.bf16.msra.mxu0 %v5426_v12  ;;  %v5482_v12 = vld [vmem:[%s5815_s3 + $0x10] sm:$0xff]  }
 0x1fb   :  { %3716 = vmatpush2.bf16.msra.mxu1 %v5423_v11  ;;  %3752 = vmatprep.subr.bf16.mxu0 %v5434_v33 }
 0x1fc   :  { %3717 = vmatprep.subr.bf16.mxu1 %v5431_v9  ;;  %v5483_v9 = vld [vmem:[%s5815_s3 + $0x48] sm:$0xff]  }
 0x1fe   :  { %3753 = vmatpush1.bf16.msra.mxu0 %v5432_v16  ;;  %v5488_v16 = vld [vmem:[%s5815_s3 + $0xb8] sm:$0xff]  }
 0x1ff   :  { %3718 = vmatpush2.bf16.msra.mxu1 %v5429_v15  ;;  %3754 = vmatprep.subr.bf16.mxu0 %v5440_v17  ;;  %v5487_v15 = vld [vmem:[%s5815_s3 + $0xf8] sm:$0xff]   ;;  %v5484_v17 = vld [vmem:[%s5815_s3 + $0x8] sm:$0xff]  }
 0x200   :  { %3719 = vmatprep.subr.bf16.mxu1 %v5437_v49  ;;  %v5489_v49 = vld [vmem:[%s5815_s3 + $0xf0] sm:$0xff]  }
 0x202   :  { %3755 = vmatpush1.bf16.msra.mxu0 %v5438_v19  ;;  %v5485_v19 = vld [vmem:[%s5815_s3 + $0x40] sm:$0xff]  }
 0x203   :  { %3720 = vmatpush2.bf16.msra.mxu1 %v5435_v20  ;;  %3762 = vmatprep.subr.bf16.mxu0 %v3123_v23  ;;  %v3781_v20 = vmax.f32 %v5699_v60, 0.0  ;;  %v5492_v60 = vld [vmem:[%s5815_s3 + $0xa8] sm:$0xff]  }
 0x204   :  { %3721 = vmatprep.subr.bf16.mxu1 %v5443_v22  ;;  %v5486_v22 = vld [vmem:[%s5815_s3] sm:$0xff]  }
 0x205   :  { %v3785_v23 = vmul.f32 %v3781_v20, %v3781_v20 }
 0x206   :  { %3763 = vmatpush2.bf16.msra.mxu0 %v3120_v29  ;;  %v5494_v29 = vld [vmem:[%s5815_s3 + $0xa0] sm:$0xff]  }
 0x207   :  { %3722 = vmatpush2.bf16.msra.mxu1 %v5441_v24  ;;  %3764 = vmatprep.subr.bf16.mxu0 %v5452_v26  ;;  %v5493_v24 = vld [vmem:[%s5815_s3 + $0xe0] sm:$0xff]   ;;  %v5495_v26 = vld [vmem:[%s5815_s3 + $0xd8] sm:$0xff]  }
 0x208   :  { %3723 = vmatprep.subr.bf16.mxu1 %v5449_v25  ;;  %v3789_v25 = vpack.c.bf16 %v3785_v23, %v3785_v23 }
 0x20a   :  { %3765 = vmatpush2.bf16.msra.mxu0 %v5450_v28 }
 0x20b   :  { %3724 = vmatpush2.bf16.msra.mxu1 %v5447_v27  ;;  %3766 = vmatprep.subr.bf16.mxu0 %v5458_v31  ;;  %v5496_v27 = vld [vmem:[%s5815_s3 + $0x98] sm:$0xff]  }
 0x20c   :  { %3725 = vmatprep.subr.bf16.mxu1 %v5455_v30  ;;  %v5497_v30 = vld [vmem:[%s5815_s3 + $0xd0] sm:$0xff]  }
 0x20e   :  { %3767 = vmatpush2.bf16.msra.mxu0 %v5456_v6 }
 0x20f   :  { %3726 = vmatpush2.bf16.msra.mxu1 %v5453_v36  ;;  %3768 = vmatprep.subr.bf16.mxu0 %v5464_v41  ;;  %v5499_v41 = vld [vmem:[%s5815_s3 + $0xc8] sm:$0xff]  }
 0x210   :  { %3727 = vmatprep.subr.bf16.mxu1 %v5461_v18 }
 0x212   :  { %3769 = vmatpush2.bf16.msra.mxu0 %v5462_v46  ;;  %v5501_v46 = vld [vmem:[%s5815_s3 + $0xc0] sm:$0xff]  }
 0x213   :  { %3728 = vmatpush2.bf16.msra.mxu1 %v5459_v45  ;;  %3770 = vmatprep.subr.bf16.mxu0 %v5470_v42 }
 0x214   :  { %3729 = vmatprep.subr.bf16.mxu1 %v5467_v47  ;;  %v5502_v47 = vld [vmem:[%s5815_s3 + $0x80] sm:$0xff]  }
 0x216   :  { %3771 = vmatpush2.bf16.msra.mxu0 %v5468_v14 }
 0x217   :  { %3730 = vmatpush2.bf16.msra.mxu1 %v5465_v38  ;;  %4671 = vmatprep.subr.bf16.mxu0 %v5471_v32 }
 0x218   :  { %4693 = vmatprep.subr.bf16.mxu1 %v5487_v15 }
 0x219   :  { %3773 = vmatmul.mubr.bf16.vlgmr.msra.gmra.mxu0 %v5655_v57  ;;  %v5476_v57 = vld [vmem:[%s5815_s3 + $0x28] sm:$0xff]  }
 0x21a   :  { %v3487_v50 = vpop.f32.mrf.mxu1  ;;  %3732 = vmatmul.mubr.bf16.vlgmr.msra.gmra.mxu1 %v5663_v13  ;;  %4672 = vmatpush3.bf16.msra.mxu0 %v5472_v53 }
 0x21b   :  { %4081 = vmatprep.mubr.bf16.mxu0 %v3790_v54  ;;  %4673 = vmatprep.subr.bf16.mxu0 %v5473_v52  ;;  %v3488_v37 = vadd.f32 %v3487_v50, %v600_v62 }
 0x21c   :  { %v3489_v56 = vpop.f32.mrf.mxu1  ;;  %4694 = vmatpush3.bf16.msra.mxu1 %v5488_v16 }
 0x21d   :  { %v3490_v3 = vadd.f32 %v3489_v56, %v604_v63  ;;  %4695 = vmatprep.subr.bf16.mxu1 %v5489_v49 }
 0x21e   :  { %v3491_v8 = vpop.f32.mrf.mxu1  ;;  %4674 = vmatpush3.bf16.msra.mxu0 %v5474_v55 }
 0x21f   :  { %4675 = vmatprep.subr.bf16.mxu0 %v5475_v58 }
 0x220   :  { %v3492_v13 = vpop.f32.mrf.mxu1  ;;  %4696 = vmatpush3.bf16.msra.mxu1 %v5490_v39 }
 0x221   :  { %4697 = vmatprep.subr.bf16.mxu1 %v5491_v40 }
 0x222   :  { %4676 = vmatpush3.bf16.msra.mxu0 %v5476_v57 }
 0x223   :  { %4677 = vmatprep.subr.bf16.mxu0 %v5477_v43 }
 0x224   :  { %4698 = vmatpush3.bf16.msra.mxu1 %v5492_v60 }
 0x225   :  { %v3528_v2 = vpop.f32.mrf.mxu0  ;;  %4699 = vmatprep.subr.bf16.mxu1 %v5493_v24 }
 0x226   :  { %v3529_v4 = vadd.f32 %v3528_v2, %v3488_v37  ;;  %4678 = vmatpush3.bf16.msra.mxu0 %v5478_v1 }
 0x227   :  { %v3530_v5 = vpop.f32.mrf.mxu0  ;;  %4679 = vmatprep.subr.bf16.mxu0 %v5479_v0 }
 0x228   :  { %v3531_v10 = vadd.f32 %v3530_v5, %v3490_v3  ;;  %4700 = vmatpush3.bf16.msra.mxu1 %v5494_v29 }
 0x229   :  { %v3532_v11 = vpop.f32.mrf.mxu0  ;;  %4701 = vmatprep.subr.bf16.mxu1 %v5495_v26 }
 0x22a   :  { %4680 = vmatpush3.bf16.msra.mxu0 %v5480_v48 }
 0x22b   :  { %v3533_v33 = vpop.f32.mrf.mxu0  ;;  %4681 = vmatprep.subr.bf16.mxu0 %v5481_v7 }
 0x22c   :  { %4702 = vmatpush3.bf16.msra.mxu1 %v5496_v27 }
 0x22d   :  { %4703 = vmatprep.subr.bf16.mxu1 %v5497_v30 }
 0x22e   :  { %4682 = vmatpush3.bf16.msra.mxu0 %v5482_v12 }
 0x22f   :  { %4683 = vmatprep.subr.bf16.mxu0 %v5483_v9 }
 0x230   :  { %4704 = vmatpush3.bf16.msra.mxu1 %v5498_v35 }
 0x231   :  { %4705 = vmatprep.subr.bf16.mxu1 %v5499_v41 }
 0x232   :  { %4684 = vmatpush3.bf16.msra.mxu0 %v5484_v17 }
 0x233   :  { %4685 = vmatprep.subr.bf16.mxu0 %v5485_v19 }
 0x234   :  { %4706 = vmatpush3.bf16.msra.mxu1 %v5500_v44 }
 0x235   :  { %4707 = vmatprep.subr.bf16.mxu1 %v5501_v46 }
 0x236   :  { %4686 = vmatpush3.bf16.msra.mxu0 %v5486_v22 }
 0x238   :  { %4708 = vmatpush3.bf16.msra.mxu1 %v5502_v47 }
 0x239   :  { %4082 = vmatmul.mubr.bf16.vlgmr.msra.gmra.mxu0 %v3789_v25 }
 0x25a   :  { %v3569_v28 = vpop.f32.mrf.mxu1 }
 0x25b   :  { %v3570_v31 = vadd.f32 %v3569_v28, %v3529_v4 }
 0x25c   :  { %v3571_v36 = vpop.f32.mrf.mxu1 }
 0x25d   :  { %v3572_v6 = vadd.f32 %v3571_v36, %v3531_v10 }
 0x25e   :  { %v3573_v18 = vpop.f32.mrf.mxu1 }
 0x260   :  { %v3574_v45 = vpop.f32.mrf.mxu1 }
 0x265   :  { %v3610_v42 = vpop.f32.mrf.mxu0 }
 0x266   :  { %v3611_v51 = vadd.f32 %v3610_v42, %v3570_v31 }
 0x267   :  { %v3612_v38 = vpop.f32.mrf.mxu0 }
 0x268   :  { %v3613_v14 = vadd.f32 %v3612_v38, %v3572_v6 }
 0x269   :  { %v3614_v32 = vpop.f32.mrf.mxu0 }
 0x26b   :  { %v3615_v21 = vpop.f32.mrf.mxu0 }
 0x29a   :  { %v3651_v53 = vpop.f32.mrf.mxu1 }
 0x29b   :  { %v3652_v8 = vadd.f32 %v3651_v53, %v3611_v51 }
 0x29c   :  { %v3653_v52 = vpop.f32.mrf.mxu1 }
 0x29d   :  { %v3654_v61 = vadd.f32 %v3653_v52, %v3613_v14 }
 0x29e   :  { %v3655_v54 = vpop.f32.mrf.mxu1 }
 0x2a0   :  { %v3656_v50 = vpop.f32.mrf.mxu1 }
 0x2a5   :  { %v3692_v55 = vpop.f32.mrf.mxu0 }
 0x2a6   :  { %v3693_v57 = vadd.f32 %v3692_v55, %v3652_v8 }
 0x2a7   :  { %v3694_v56 = vpop.f32.mrf.mxu0 }
 0x2a8   :  { %v3695_v34 = vadd.f32 %v3694_v56, %v3654_v61 }
 0x2a9   :  { %v3696_v58 = vpop.f32.mrf.mxu0 }
 0x2ab   :  { %v3697_v59 = vpop.f32.mrf.mxu0 }
 0x2d9   :  { %v3774_v43 = vpop.f32.mrf.mxu0 }
 0x2da   :  { %v3733_v13 = vpop.f32.mrf.mxu1 }
 0x2db   :  { %v3734_v62 = vadd.f32 %v3733_v13, %v3693_v57  ;;  %v3776_v1 = vpop.f32.mrf.mxu0 }
 0x2dc   :  { %v3735_v63 = vpop.f32.mrf.mxu1 }
 0x2dd   :  { %v3775_v0 = vadd.f32 %v3774_v43, %v3734_v62  ;;  %v3736_v37 = vadd.f32 %v3735_v63, %v3695_v34  ;;  %v3778_v3 = vpop.f32.mrf.mxu0 }
 0x2de   :  { %v3737_v2 = vpop.f32.mrf.mxu1 }
 0x2df   :  { %v3783_v4 = vmax.f32 %v3775_v0, 0.0  ;;  %v3777_v48 = vadd.f32 %v3776_v1, %v3736_v37  ;;  %v3779_v7 = vpop.f32.mrf.mxu0 }
 0x2e0   :  { %v3738_v5 = vpop.f32.mrf.mxu1 }
 0x2e1   :  { %v3784_v10 = vmax.f32 %v3777_v48, 0.0  ;;  %v3787_v11 = vmul.f32 %v3783_v4, %v3783_v4 }
 0x2e3   :  { %v3788_v12 = vmul.f32 %v3784_v10, %v3784_v10  ;;  %v3791_v33 = vpack.c.bf16 %v3787_v11, %v3787_v11 }
 0x2e5   :  { %v3792_v9 = vpack.c.bf16 %v3788_v12, %v3788_v12 }
 0x2e7   :  { %4121 = vmatprep.mubr.bf16.mxu1 %v3792_v9 }
 0x2e8   :  { %4122 = vmatmul.mubr.bf16.vlgmr.msra.gmra.mxu1 %v3791_v33 }
 0x2f9   :  { %v4687_v15 = vpop.f32.mrf.mxu0 }
 0x2fb   :  { %v4688_v16 = vpop.f32.mrf.mxu0 }
 0x2fc   :  { %v4689_v49 = vadd.f32 %v4688_v16, %v4687_v15 }
 0x2fd   :  { %v4690_v17 = vpop.f32.mrf.mxu0 }
 0x2ff   :  { %v4691_v39 = vpop.f32.mrf.mxu0 }
 0x3a8   :  { %v4709_v20 = vpop.f32.mrf.mxu1 }
 0x3aa   :  { %v4710_v19 = vpop.f32.mrf.mxu1 }
 0x3ab   :  { %v4711_v40 = vadd.f32 %v4710_v19, %v4709_v20 }
 0x3ac   :  { %v4712_v22 = vpop.f32.mrf.mxu1 }
 0x3ad   :  { %v4124_v60 = vadd.f32 %v4711_v40, %v4689_v49 }
 0x3ae   :  { %v4713_v23 = vpop.f32.mrf.mxu1 }
 0x3af   :  { %4130 = vst.msk [vmem:[%s5816_s4] sm:$0xff] %vm4129_vm3, %v4124_v60 }
 0x3b0   :  { %4135 = vsyncpa [#allocation3], 1 }
 0x3b1   :  { %4136 = vsyncpa [#allocation5], 1 }

</bundles_post_ra>
